<compile_context>
chip_gen: v7x
topology: tpu7x:2x2x1
jax: 0.10.0
libtpu: 0.0.40
codegen_flags: <defaults>
</compile_context>

<pallas_src>
import math
import jax
import jax.numpy as jnp
from jax.experimental import pallas as pl
from jax.experimental.pallas import tpu as pltpu


def self_attention_kernel(x_ref, w_ref, c_ref, o_ref):
    """One batch tile.

    x_ref : [TB, D] f32   streamed batch tile
    w_ref : [D, D]  bf16  fused weight  W = Wv @ Wo      (VMEM-resident)
    c_ref : [8, D]  f32   row 0 = fused bias (bv@Wo+bo), row 1 = gamma, row 2 = beta
    o_ref : [TB, D] f32

    NOTE: valid only because the module's seq_len is 1 by construction
    (x.unsqueeze(1)); do NOT reuse for seq_len > 1, where softmax != 1.
    """
    x = x_ref[...]

    # Single fused MXU matmul (bf16 operands, f32 accumulation) + fused bias.
    out = jnp.dot(x.astype(jnp.bfloat16), w_ref[...],
                  preferred_element_type=jnp.float32)
    out = out + c_ref[0:1, :]

    # residual + LayerNorm (eps = 1e-5, biased variance, matches torch).
    y = x + out
    mean = jnp.mean(y, axis=-1, keepdims=True)
    yc = y - mean
    var = jnp.mean(yc * yc, axis=-1, keepdims=True)
    normed = yc * jax.lax.rsqrt(var + 1e-5)
    o_ref[...] = normed * c_ref[1:2, :] + c_ref[2:3, :]


def prepare_self_attention_params(params, num_heads):
    """One-time weight preparation. Call OUTSIDE the hot path (the fusion and
    the bf16 cast must not be re-done per forward call)."""
    D = params["wv"].shape[0]
    assert D % num_heads == 0, "embed_dim must be divisible by num_heads"
    # Exact fold of the two linears (valid since attn_output == v at seq_len==1).
    w_fused = (params["wv"].astype(jnp.float32)
               @ params["wo"].astype(jnp.float32)).astype(jnp.bfloat16)
    b_fused = params["bv"] @ params["wo"] + params["bo"]          # [1, D]
    consts = jnp.zeros((8, D), jnp.float32)
    consts = consts.at[0, :].set(b_fused[0])
    consts = consts.at[1, :].set(params["gamma"][0])
    consts = consts.at[2, :].set(params["beta"][0])
    return {"w": w_fused, "consts": consts}


def _choose_tile_b(b_pad, d, max_tile_b=1024, tile_budget_bytes=24 << 20):
    """Largest multiple-of-8 divisor of b_pad under the VMEM tile budget,
    keeping >= 2 grid steps when possible (so the parallel axis can shard
    across both v7x TensorCores)."""
    best = None
    t = 8
    while t <= min(max_tile_b, b_pad):
        # x tile + out tile, double-buffered, f32.
        if b_pad % t == 0 and 2 * 2 * t * d * 4 <= tile_budget_bytes:
            best = t
        t += 8
    if best is None:
        best = b_pad                      # tiny batch: one whole-array block
    if best == b_pad and b_pad >= 16 and (b_pad // 2) % 8 == 0:
        best = b_pad // 2                 # keep at least 2 "parallel" steps
    return best


def self_attention_pallas(x, prepared, *, max_tile_b=1024):
    """x: [B, D] f32.  prepared: output of prepare_self_attention_params."""
    assert x.ndim == 2, "module attends over seq_len==1 only; x must be [B, D]"
    B, D = x.shape
    w = prepared["w"]          # [D, D] bf16
    consts = prepared["consts"]  # [8, D] f32

    # Pad the batch to a multiple of 8 (sublane rule) instead of whole-B tiles.
    B_pad = -(-B // 8) * 8
    tile_b = _choose_tile_b(B_pad, D, max_tile_b)
    grid = (B_pad // tile_b,)
    x_in = x if B_pad == B else jnp.pad(x, ((0, B_pad - B), (0, 0)))

    # VMEM request: resident bf16 weight + packed consts (2x buffering slack)
    # plus double-buffered f32 in/out tiles, with headroom.  Clamped to the
    # v7x physical 64 MiB.
    # TODO(synk): for D beyond ~5k the fused (D, D) bf16 weight no longer fits
    # v7x VMEM; add a second grid axis tiling the output columns of W.
    resident_bytes = 2 * (D * D * 2 + 8 * D * 4)
    tile_bytes = 2 * 2 * tile_b * D * 4
    vmem_limit = min(max(resident_bytes + tile_bytes + (4 << 20), 16 << 20),
                     64 << 20)

    def resident(shape):
        # Same block every grid step -> stays VMEM-resident, no re-DMA.
        return pl.BlockSpec(shape, lambda i: (0, 0))

    out = pl.pallas_call(
        self_attention_kernel,
        out_shape=jax.ShapeDtypeStruct((B_pad, D), jnp.float32),
        grid=grid,
        in_specs=[
            pl.BlockSpec((tile_b, D), lambda i: (i, 0)),   # x: streamed tiles
            resident((D, D)),                              # fused weight
            resident((8, D)),                              # bias/gamma/beta pack
        ],
        out_specs=pl.BlockSpec((tile_b, D), lambda i: (i, 0)),
        compiler_params=pltpu.CompilerParams(
            dimension_semantics=("parallel",),
            vmem_limit_bytes=vmem_limit),
    )(x_in, w, consts)

    return out if B_pad == B else out[:B]


def self_attention_ref(x, params, num_heads):
    """Pure-JAX f32 reference mirroring the full PyTorch forward (eval mode),
    including the q/k/score/softmax path that the kernel elides exactly."""
    B, D = x.shape
    H = num_heads
    hd = D // H
    q = x @ params["wq"] + params["bq"][0]
    k = x @ params["wk"] + params["bk"][0]
    v = x @ params["wv"] + params["bv"][0]
    q = q.reshape(B, H, 1, hd)
    k = k.reshape(B, H, 1, hd)
    v = v.reshape(B, H, 1, hd)
    scores = jnp.einsum("bhqd,bhkd->bhqk", q, k) / math.sqrt(hd)
    attn_w = jax.nn.softmax(scores, axis=-1)
    attn_out = jnp.einsum("bhqk,bhkd->bhqd", attn_w, v).reshape(B, D)
    out = attn_out @ params["wo"] + params["bo"][0]
    y = x + out
    mean = jnp.mean(y, axis=-1, keepdims=True)
    var = jnp.mean((y - mean) ** 2, axis=-1, keepdims=True)
    normed = (y - mean) / jnp.sqrt(var + 1e-5)
    return normed * params["gamma"][0] + params["beta"][0]


def make_params(key, embed_dim):
    D = embed_dim
    keys = jax.random.split(key, 8)
    scale = 0.02
    # Weights stored as [D_in, D_out] (already transposed vs torch's [out, in]).
    return {
        "wq": scale * jax.random.normal(keys[0], (D, D), jnp.float32),
        "bq": scale * jax.random.normal(keys[1], (1, D), jnp.float32),
        "wk": scale * jax.random.normal(keys[2], (D, D), jnp.float32),
        "bk": scale * jax.random.normal(keys[3], (1, D), jnp.float32),
        "wv": scale * jax.random.normal(keys[4], (D, D), jnp.float32),
        "bv": scale * jax.random.normal(keys[5], (1, D), jnp.float32),
        "wo": scale * jax.random.normal(keys[6], (D, D), jnp.float32),
        "bo": scale * jax.random.normal(keys[7], (1, D), jnp.float32),
        "gamma": jnp.ones((1, D), jnp.float32),
        "beta": jnp.zeros((1, D), jnp.float32),
    }


if __name__ == "__main__":
    key = jax.random.PRNGKey(0)
    cases = [
        # (B, D, num_heads)
        (1024, 128, 8),   # lane-dense D, tile_b=512 -> 2 "parallel" grid steps
        (10, 32, 8),      # small ragged batch -> pad-to-8 path, sub-128 D
    ]
    for B, D, H in cases:
        kx, kp, key = jax.random.split(key, 3)
        x = jax.random.normal(kx, (B, D), jnp.float32)
        params = make_params(kp, D)
        prepared = prepare_self_attention_params(params, H)  # one-time prep

        out = jax.block_until_ready(self_attention_pallas(x, prepared))
        ref = self_attention_ref(x, params, H)

        assert out.shape == (B, D)
        # bf16 fused-weight matmul vs pure-f32 reference -> bf16 tolerance.
        assert jnp.allclose(out, ref, atol=2e-2, rtol=2e-2), \
            f"mismatch vs. reference at B={B}, D={D}"

    print("KERNEL_OK")
</pallas_src>

<mosaic_0001>
module attributes {stable_mosaic.version = 11 : i64} {
  func.func @self_attention_kernel(%arg0: i32, %arg1: memref<512x128xf32, #tpu.memory_space<vmem>>, %arg2: memref<128x128xbf16, #tpu.memory_space<vmem>>, %arg3: memref<8x128xf32, #tpu.memory_space<vmem>>, %arg4: memref<512x128xf32, #tpu.memory_space<vmem>>) attributes {dimension_semantics = [#tpu.dimension_semantics<parallel>], iteration_bounds = array<i64: 2>, scalar_prefetch = 0 : i64, scratch_operands = 0 : i64, tpu.core_type = #tpu.core_type<tc>, window_params = [{transform_indices = @transform_0, window_bounds = array<i64: 512, 128>}, {pipeline_mode = #tpu.pipeline_mode<synchronous>, transform_indices = @transform_1, window_bounds = array<i64: 128, 128>}, {pipeline_mode = #tpu.pipeline_mode<synchronous>, transform_indices = @transform_2, window_bounds = array<i64: 8, 128>}, {transform_indices = @transform_3, window_bounds = array<i64: 512, 128>}]} {
    %c0 = arith.constant 0 : index
    %c0_0 = arith.constant 0 : index
    %0 = vector.load %arg1[%c0, %c0_0] : memref<512x128xf32, #tpu.memory_space<vmem>>, vector<512x128xf32>
    %1 = arith.truncf %0 : vector<512x128xf32> to vector<512x128xbf16>
    %c0_1 = arith.constant 0 : index
    %c0_2 = arith.constant 0 : index
    %2 = vector.load %arg2[%c0_1, %c0_2] : memref<128x128xbf16, #tpu.memory_space<vmem>>, vector<128x128xbf16>
    %cst = arith.constant dense<0.000000e+00> : vector<512x128xf32>
    %3 = tpu.matmul %1, %2, %cst {dimension_numbers = #tpu.dot_dimension_numbers<[1], [0], [0], [1], [0, 0, 1, 1], [], []>} : vector<512x128xbf16>, vector<128x128xbf16>, vector<512x128xf32> -> vector<512x128xf32>
    %c0_3 = arith.constant 0 : index
    %c0_4 = arith.constant 0 : index
    %4 = vector.load %arg3[%c0_3, %c0_4] : memref<8x128xf32, #tpu.memory_space<vmem>>, vector<1x128xf32>
    %5 = vector.broadcast %4 : vector<1x128xf32> to vector<512x128xf32>
    %6 = arith.addf %3, %5 : vector<512x128xf32>
    %7 = arith.addf %0, %6 : vector<512x128xf32>
    %cst_5 = arith.constant dense<0.000000e+00> : vector<512xf32>
    %8 = vector.multi_reduction <add>, %7, %cst_5 [1] : vector<512x128xf32> to vector<512xf32>
    %9 = vector.shape_cast %8 : vector<512xf32> to vector<512x1xf32>
    %cst_6 = arith.constant 1.280000e+02 : f32
    %10 = vector.broadcast %cst_6 : f32 to vector<512x1xf32>
    %11 = arith.divf %9, %10 : vector<512x1xf32>
    %12 = vector.broadcast %11 : vector<512x1xf32> to vector<512x128xf32>
    %13 = arith.subf %7, %12 : vector<512x128xf32>
    %14 = arith.mulf %13, %13 : vector<512x128xf32>
    %cst_7 = arith.constant dense<0.000000e+00> : vector<512xf32>
    %15 = vector.multi_reduction <add>, %14, %cst_7 [1] : vector<512x128xf32> to vector<512xf32>
    %16 = vector.shape_cast %15 : vector<512xf32> to vector<512x1xf32>
    %cst_8 = arith.constant 1.280000e+02 : f32
    %17 = vector.broadcast %cst_8 : f32 to vector<512x1xf32>
    %18 = arith.divf %16, %17 : vector<512x1xf32>
    %cst_9 = arith.constant 9.99999974E-6 : f32
    %19 = vector.broadcast %cst_9 : f32 to vector<512x1xf32>
    %20 = arith.addf %18, %19 : vector<512x1xf32>
    %21 = math.rsqrt %20 : vector<512x1xf32>
    %22 = vector.broadcast %21 : vector<512x1xf32> to vector<512x128xf32>
    %23 = arith.mulf %13, %22 : vector<512x128xf32>
    %c1 = arith.constant 1 : index
    %c0_10 = arith.constant 0 : index
    %24 = vector.load %arg3[%c1, %c0_10] : memref<8x128xf32, #tpu.memory_space<vmem>>, vector<1x128xf32>
    %25 = vector.broadcast %24 : vector<1x128xf32> to vector<512x128xf32>
    %26 = arith.mulf %23, %25 : vector<512x128xf32>
    %c2 = arith.constant 2 : index
    %c0_11 = arith.constant 0 : index
    %27 = vector.load %arg3[%c2, %c0_11] : memref<8x128xf32, #tpu.memory_space<vmem>>, vector<1x128xf32>
    %28 = vector.broadcast %27 : vector<1x128xf32> to vector<512x128xf32>
    %29 = arith.addf %26, %28 : vector<512x128xf32>
    %c0_12 = arith.constant 0 : index
    %c0_13 = arith.constant 0 : index
    %30 = vector.load %arg4[%c0_12, %c0_13] : memref<512x128xf32, #tpu.memory_space<vmem>>, vector<512x128xf32>
    tpu.vector_store %arg4[%c0_12, %c0_13], %29 {strides = array<i32>} : memref<512x128xf32, #tpu.memory_space<vmem>>, vector<512x128xf32>,
    return
  }
  func.func @transform_0(%arg0: i32) -> (i32, i32) {
    %c0_i32 = arith.constant 0 : i32
    %c0_i32_0 = arith.constant 0 : i32
    return %arg0, %c0_i32 : i32, i32
  }
  func.func @transform_1(%arg0: i32) -> (i32, i32) {
    %c0_i32 = arith.constant 0 : i32
    %c0_i32_0 = arith.constant 0 : i32
    %c0_i32_1 = arith.constant 0 : i32
    return %c0_i32, %c0_i32_0 : i32, i32
  }
  func.func @transform_2(%arg0: i32) -> (i32, i32) {
    %c0_i32 = arith.constant 0 : i32
    %c0_i32_0 = arith.constant 0 : i32
    %c0_i32_1 = arith.constant 0 : i32
    return %c0_i32, %c0_i32_0 : i32, i32
  }
  func.func @transform_3(%arg0: i32) -> (i32, i32) {
    %c0_i32 = arith.constant 0 : i32
    %c0_i32_0 = arith.constant 0 : i32
    return %arg0, %c0_i32 : i32, i32
  }
}

</mosaic_0001>

<bundles_post_ra>
// kernel: tpu_custom_call.1
= control target key start
LH: loop header
LB: loop body
LE: loop exit
PB: predicated region body
PF: predicated region fallthrough
CT: control target
= control target key end

     0   :  { %8 = vsyncpa [#allocation3], 0  ;;  %s3823_s0 = inlined_call_operand.hbm [shape: f32[1024,128], index: 0, kind: input, shape index: {}]   ;;  %s3824_s1 = inlined_call_operand.hbm [shape: bf16[128,128], index: 1, kind: input, shape index: {}]   ;;  %s3825_s2 = inlined_call_operand.hbm [shape: f32[8,128], index: 2, kind: input, shape index: {}]   ;;  %s3826_s3 = inlined_call_operand.hbm [shape: f32[1024,128], index: 3, kind: output, shape index: {}]  }
   0x1   :  { %10 = vsyncpa [#allocation3 + $0x1], 0 }
   0x2   :  { %11 = vsyncpa [#allocation6], 0 }
   0x3   :  { %12 = vsyncpa [#allocation4], 0 }
   0x4   :  { %14 = vsyncpa [#allocation4 + $0x1], 0  ;;  %s2316_s12 = smov 0   ;;  %s2318_s13 = smov 0  }
   0x5   :  { %s2320_s14 = smov 0   ;;  %s2322_s15 = smov 0  }
   0x6 LB: > { %s2337_s16 = sadd.s32 4294967295, %s2284_s15   ;;  %s1750_s17 = sadd.s32 4294967294, %s2284_s15   ;;  %s2284_s15 = sphi %s2322_s15, %s4032_s15   ;;  %s2280_s14 = sphi %s2320_s14, %s4031_s14   ;;  %s2276_s13 = sphi %s2318_s13, %s4030_s13   ;;  %s2272_s12 = sphi %s2316_s12, %s4029_s12  }
   0x7   : > { %p40_p0 = scmp.ne.s32.totalorder %s2276_s13, %s2272_s12  ;;  %p3827_p1 = scmp.eq.s32.totalorder %s2337_s16, 0 }
   0x8   : > { %p112_p3 = scmp.eq.s32.totalorder %s1750_s17, 1  ;;  %p1751_p5 = scmp.ge.s32.totalorder %s2284_s15, 1 }
   0x9   : > { %p2346_p4 = por %p3827_p1, %p40_p0  ;;  %p119_p7 = scmp.lt.s32.totalorder %s2284_s15, 3 }
   0xa   : > { %p2351_p6 = por %p112_p3, %p40_p0  ;;  %s2286_s21 = smov [#allocation5]  }
   0xb   : > { %s3892_s18 = scalar_select %p2346_p4, 1, 0 }
   0xc   : > { %s3893_s19 = scalar_select %p2351_p6, 1, 0 }
   0xd   : > { %p2356_p8 = pnand %p1751_p5, %p119_p7  ;;  %s131_s22 = sshll.u32 %s2286_s21, 4  ;;  %s2360_s22 = int_to_ptr.vmem [resolvable:$true] %s131_s22 }
   0xe   : > { %s2287_s24 = smov [#allocation7]   ;;  %s2128_s28 = scalar_lea.hbm %s3824_s1, 1024 }
   0xf   : > { %p1929_p9 = pneg %p2356_p8  ;;  %s145_s25 = sshll.u32 %s2287_s24, 4  ;;  %s2371_s25 = int_to_ptr.vmem [resolvable:$true] %s145_s25 }
  0x10   : > { %p2129_p12 = scmp.ne.s32.totalorder %s3824_s1, %s2128_s28  ;;  %p2135_p5 = scmp.lt.u32.totalorder %s2128_s28, %s3824_s1 }
  0x11   : > { %p2367_p11 = pnand %p1929_p9, %p3827_p1 }
  0x13   : > { %p2130_p13 = pneg %p2367_p11 }
  0x15   : > { %p2131_p0 = pnand %p2130_p13, %p2129_p12 }
  0x17   : > { %p2132_p3 = pneg %p2131_p0 }
  0x19   : > { %p2137_p7 = pnand %p2135_p5, %p2132_p3 }
  0x1b   : > { %2140 = shalt.err (!%p2137_p7)
}
  0x1c   : > { %s2141_s6 = scalar_lea.vmem %s2360_s22, 1024  ;;  %p2149_p2 = scmp.lt.s32.totalorder %s2360_s22, %s2360_s22 }
  0x1d   : > { %p2142_p9 = scmp.ne.s32.totalorder %s2360_s22, %s2141_s6  ;;  %p2150_p12 = scmp.lt.s32.totalorder %s2141_s6, %s2141_s6 }
  0x1f   : > { %p2144_p10 = pnand %p2142_p9, %p2130_p13  ;;  %p2151_p0 = por %p2150_p12, %p2149_p2 }
  0x21   : > { %p2145_p1 = pneg %p2144_p10 }
  0x23   : > { %p2152_p6 = pnand %p2151_p0, %p2145_p1 }
  0x25   : > { %2155 = shalt.err (!%p2152_p6)
}
  0x26   : > { %s2288_s7 = smov 64   ;;  %s2289_s8 = smov 4  }
  0x27   : > { %1932 = dma.hbm_to_vmem [thread:$0]  (!%p2367_p11), %s3824_s1, 1024, %s2360_s22, [#allocation6], %s2288_s7, %s2288_s7, %s2289_s8  }
  0x28   : > { %s2156_s21 = scalar_lea.hbm %s3825_s2, 128 }
  0x29   : > { %p2157_p2 = scmp.ne.s32.totalorder %s3825_s2, %s2156_s21  ;;  %p2163_p10 = scmp.lt.u32.totalorder %s2156_s21, %s3825_s2 }
  0x2b   : > { %p2159_p1 = pnand %p2157_p2, %p2130_p13 }
  0x2d   : > { %p2160_p6 = pneg %p2159_p1 }
  0x2f   : > { %p2165_p3 = pnand %p2163_p10, %p2160_p6 }
  0x31   : > { %2168 = shalt.err (!%p2165_p3)
}
  0x32   : > { %s2169_s22 = scalar_lea.vmem %s2371_s25, 128  ;;  %p2177_p12 = scmp.lt.s32.totalorder %s2371_s25, %s2371_s25 }
  0x33   : > { %p2170_p5 = scmp.ne.s32.totalorder %s2371_s25, %s2169_s22  ;;  %p2178_p0 = scmp.lt.s32.totalorder %s2169_s22, %s2169_s22 }
  0x35   : > { %p2172_p7 = pnand %p2170_p5, %p2130_p13  ;;  %p2179_p2 = por %p2178_p0, %p2177_p12 }
  0x37   : > { %p2173_p9 = pneg %p2172_p7 }
  0x39   : > { %p2180_p1 = pnand %p2179_p2, %p2173_p9 }
  0x3b   : > { %2183 = shalt.err (!%p2180_p1)
}
  0x3c   : > { %1935 = dma.hbm_to_vmem [thread:$0]  (!%p2367_p11), %s3825_s2, 128, %s2371_s25, [#allocation6]  }
  0x3d   : > { %s2426_s4 = sadd.s32 1, %s2284_s15   ;;  %s27_s23 = sadd.s32 1, %s2280_s14 }
  0x3e   : > { %s24_s5 = ssub.s32 %s2284_s15, %s2426_s4  ;;  %p34_p13 = scmp.ne.s32.totalorder %s2280_s14, %s2276_s13 }
  0x3f   : > { %p25_p6 = scmp.eq.s32.totalorder %s24_s5, 0  ;;  %p35_p10 = scmp.eq.s32.totalorder %s2284_s15, 0 }
  0x40   : > { %p3896_p3 = scmp.eq.s32.totalorder %s2337_s16, 1  ;;  %p1946_p7 = scmp.lt.s32.totalorder %s2284_s15, 2 }
  0x41   : > { %s2442_s7 = scalar_select %p25_p6, %s2280_s14, %s27_s23  }
  0x42   : > { %p2436_p5 = por %p3896_p3, %p34_p13  ;;  %p36_p9 = por %p35_p10, %p34_p13 }
  0x43   : > { %s156_s8 = sand.u32 1, %s2280_s14   ;;  %s1779_s25 = sshll.u32 %s2284_s15, 13 }
  0x44   : > { %s3897_s6 = scalar_select %p2436_p5, 1, 0 }
  0x45   : > { %s1755_s9 = sshll.u32 %s156_s8, 9  ;;  %s2449_s17 = scalar_lea.hbm %s3823_s0, %s1779_s25 }
  0x46   : > { %s160_s21 = scalar_lea.vmem [#allocation2], %s1755_s9  ;;  %p2453_p11 = pnand %p1946_p7, %p36_p9 }
  0x47   : > { %s167_s24 = sshll.u32 %s160_s21, 4  ;;  %s2457_s27 = scalar_lea.sflag [#allocation3], %s156_s8  ;;  %s2451_s24 = int_to_ptr.vmem [resolvable:$true] %s167_s24 }
  0x48   : > { %s2184_s28 = scalar_lea.hbm %s2449_s17, 8192  ;;  %p2186_p0 = pneg %p2453_p11 }
  0x49   : > { %p2185_p12 = scmp.ne.s32.totalorder %s2449_s17, %s2184_s28  ;;  %s2189_s30 = scalar_lea.hbm %s3823_s0, 16384 }
  0x4a   : > { %p2190_p13 = scmp.lt.u32.totalorder %s2449_s17, %s3823_s0  ;;  %p2191_p6 = scmp.lt.u32.totalorder %s2189_s30, %s2184_s28 }
  0x4b   : > { %p2187_p2 = pnand %p2186_p0, %p2185_p12  ;;  %p2193_p3 = scmp.lt.u32.totalorder %s2184_s28, %s2449_s17 }
  0x4c   : > { %p2192_p10 = por %p2191_p6, %p2190_p13 }
  0x4d   : > { %p2188_p1 = pneg %p2187_p2 }
  0x4e   : > { %p2194_p7 = por %p2193_p3, %p2192_p10 }
  0x50   : > { %p2195_p9 = pnand %p2194_p7, %p2188_p1 }
  0x52   : > { %2198 = shalt.err (!%p2195_p9)
}
  0x53   : > { %s2199_s8 = scalar_lea.vmem %s2451_s24, 8192  ;;  %s2290_s9 = smov [#allocation2]  }
  0x54   : > { %p2200_p12 = scmp.ne.s32.totalorder %s2451_s24, %s2199_s8  ;;  %s2204_s25 = sshll.u32 %s2290_s9, 4  ;;  %s2205_s25 = int_to_ptr.vmem [resolvable:$false] %s2204_s25 }
  0x55   : > { %s2206_s10 = scalar_lea.vmem %s2205_s25, 16384  ;;  %p2207_p4 = scmp.lt.s32.totalorder %s2451_s24, %s2205_s25 }
  0x56   : > { %p2202_p2 = pnand %p2200_p12, %p2186_p0  ;;  %p2208_p13 = scmp.lt.s32.totalorder %s2206_s10, %s2199_s8 }
  0x58   : > { %p2203_p5 = pneg %p2202_p2  ;;  %p2209_p6 = por %p2208_p13, %p2207_p4 }
  0x5a   : > { %p2210_p10 = pnand %p2209_p6, %p2203_p5 }
  0x5c   : > { %2213 = shalt.err (!%p2210_p10)
}
  0x5d   : > { %s2291_s11 = smov 128   ;;  %s2292_s21 = smov 8  }
  0x5e   : > { %1939 = dma.hbm_to_vmem [thread:$0]  (!%p2453_p11), %s2449_s17, 8192, %s2451_s24, %s2457_s27, %s2291_s11, %s2291_s11, %s2292_s21  }
  0x5f   : > { %179 = sbr.rel (%p2356_p8) target bundleno = 813 (0x32d), region = 32 }
  0x66   : > { %s2488_s28 = sand.u32 1, %s2276_s13   ;;  %p3899_p4 = scmp.ne.s32.totalorder %s3892_s18, 0 }
  0x67   : > { %s1759_s22 = sshll.u32 %s2488_s28, 9  ;;  %s182_s29 = scalar_lea.sflag [#allocation3], %s2488_s28 }
  0x68   : > { %s2494_s30 = scalar_lea.vmem [#allocation2], %s1759_s22 }
  0x69   : > { %2259 = dma.done.wait (%p3899_p4), %s182_s29, 8192  }
  0x6a   : > { %2261 = vsyncadd (%p3899_p4), %s182_s29, 4294959104  ;;  %p3900_p5 = scmp.eq.s32.totalorder %s2337_s16, 0 }
  0x6c   : > { %2263 = dma.done.wait (%p3900_p5), [#allocation6], 1152   ;;  %p3901_p8 = pmov %p3900_p5 }
  0x6d   : > { %v1990_v0 = vld [vmem:[#allocation5] sm:$0xff]   ;;  %v1991_v1 = vld [vmem:[#allocation5 + $0x8] sm:$0xff]   ;;  %v1992_v2 = vld [vmem:[#allocation5 + $0x10] sm:$0xff]   ;;  %s3533_s18 = scalar_lea.vmem [#allocation8], %s1759_s22  ;;  %s1780_s20 = sshll.u32 %s2337_s16, 13 }
  0x6e   : > { %2265 = vsyncadd (%p3901_p8), [#allocation6], 4294966144  ;;  %1821 = vmatprep.subr.bf16.mxu0 %v1990_v0  ;;  %1901 = vmatprep.subr.bf16.mxu1 %v1990_v0  ;;  %v1993_v3 = vld [vmem:[#allocation5 + $0x18] sm:$0xff]   ;;  %v2505_v4 = vld [vmem:[%s2494_s30] sm:$0xff]  ;;  %s1658_s17 = sshll.u32 %s3533_s18, 4  ;;  %s3775_s27 = scalar_lea.hbm %s3826_s3, %s1780_s20  ;;  %s3777_s17 = int_to_ptr.vmem [resolvable:$true] %s1658_s17 }
  0x6f   : > { %1822 = vmatpush3.bf16.msra.mxu0 %v1990_v0  ;;  %1909 = vmatpush3.bf16.msra.mxu1 %v1990_v0  ;;  %v2508_v5 = vld [vmem:[%s2494_s30 + $0x8] sm:$0xff]  ;;  %v2511_v6 = vld [vmem:[%s2494_s30 + $0x100] sm:$0xff]  ;;  %v1996_v12 = vld [vmem:[#allocation5 + $0x30] sm:$0xff]   ;;  %s1645_s16 = scalar_lea.sflag [#allocation4], %s2488_s28  ;;  %s2214_s23 = scalar_lea.vmem %s3777_s17, 8192 }
  0x70   : > { %1823 = vmatprep.subr.bf16.mxu0 %v1991_v1  ;;  %1902 = vmatprep.subr.bf16.mxu1 %v1991_v1  ;;  %v283_v7 = vpack.c.bf16 %v2508_v5, %v2505_v4  ;;  %v2516_v8 = vld [vmem:[%s2494_s30 + $0x108] sm:$0xff]  ;;  %v1994_v10 = vld [vmem:[#allocation5 + $0x20] sm:$0xff]   ;;  %v1997_v13 = vld [vmem:[#allocation5 + $0x38] sm:$0xff]   ;;  %p2215_p11 = scmp.ne.s32.totalorder %s3777_s17, %s2214_s23  ;;  %p4026_p0 = scmp.ne.s32.totalorder %s3897_s6, 0 }
  0x71   : > { %v299_v9 = vpack.c.bf16 %v2516_v8, %v2511_v6  ;;  %v1995_v11 = vld [vmem:[#allocation5 + $0x28] sm:$0xff]   ;;  %v2521_v14 = vld [vmem:[%s2494_s30 + $0x10] sm:$0xff]  ;;  %v2524_v15 = vld [vmem:[%s2494_s30 + $0x18] sm:$0xff]  ;;  %s2293_s5 = smov [#allocation8]  }
  0x72   : > { %1837 = vmatprep.mubr.bf16.mxu0 %v283_v7  ;;  %v2527_v16 = vld [vmem:[%s2494_s30 + $0x110] sm:$0xff]  ;;  %v2530_v17 = vld [vmem:[%s2494_s30 + $0x118] sm:$0xff]  ;;  %v2533_v18 = vld [vmem:[%s2494_s30 + $0x20] sm:$0xff]  ;;  %v284_v22 = vpack.c.bf16 %v2524_v15, %v2521_v14  ;;  %p2216_p1 = pnand %p2215_p11, %p4026_p0  ;;  %s2218_s8 = sshll.u32 %s2293_s5, 4  ;;  %s2219_s8 = int_to_ptr.vmem [resolvable:$false] %s2218_s8 }
  0x73   : > { %1824 = vmatpush3.bf16.msra.mxu0 %v1991_v1  ;;  %1910 = vmatpush3.bf16.msra.mxu1 %v1991_v1  ;;  %v2536_v19 = vld [vmem:[%s2494_s30 + $0x28] sm:$0xff]  ;;  %v2539_v20 = vld [vmem:[%s2494_s30 + $0x120] sm:$0xff]  ;;  %v300_v23 = vpack.c.bf16 %v2530_v17, %v2527_v16  ;;  %v2553_v26 = vld [vmem:[%s2494_s30 + $0x30] sm:$0xff]  ;;  %s2220_s9 = scalar_lea.vmem %s2219_s8, 16384  ;;  %p2221_p7 = scmp.lt.s32.totalorder %s3777_s17, %s2219_s8 }
  0x74   : > { %1825 = vmatprep.subr.bf16.mxu0 %v1992_v2  ;;  %1903 = vmatprep.subr.bf16.mxu1 %v1992_v2  ;;  %v2542_v21 = vld [vmem:[%s2494_s30 + $0x128] sm:$0xff]  ;;  %v285_v24 = vpack.c.bf16 %v2536_v19, %v2533_v18  ;;  %v2556_v27 = vld [vmem:[%s2494_s30 + $0x38] sm:$0xff]  ;;  %v2559_v28 = vld [vmem:[%s2494_s30 + $0x130] sm:$0xff]  ;;  %p2217_p3 = pneg %p2216_p1  ;;  %p2222_p9 = scmp.lt.s32.totalorder %s2220_s9, %s2214_s23 }
  0x75   : > { %1869 = vmatprep.mubr.bf16.mxu1 %v299_v9  ;;  %v301_v25 = vpack.c.bf16 %v2542_v21, %v2539_v20  ;;  %v2562_v29 = vld [vmem:[%s2494_s30 + $0x138] sm:$0xff]  ;;  %v2565_v30 = vld [vmem:[%s2494_s30 + $0x40] sm:$0xff]  ;;  %v2568_v31 = vld [vmem:[%s2494_s30 + $0x48] sm:$0xff]  ;;  %v286_v34 = vpack.c.bf16 %v2556_v27, %v2553_v26 }
  0x76   : > { %v2571_v32 = vld [vmem:[%s2494_s30 + $0x140] sm:$0xff]  ;;  %v2574_v33 = vld [vmem:[%s2494_s30 + $0x148] sm:$0xff]  ;;  %v302_v35 = vpack.c.bf16 %v2562_v29, %v2559_v28  ;;  %v287_v36 = vpack.c.bf16 %v2568_v31, %v2565_v30  ;;  %v2585_v38 = vld [vmem:[%s2494_s30 + $0x50] sm:$0xff]  ;;  %p2223_p12 = por %p2222_p9, %p2221_p7 }
  0x77   : > { %1826 = vmatpush3.bf16.msra.mxu0 %v1992_v2  ;;  %1911 = vmatpush3.bf16.msra.mxu1 %v1992_v2  ;;  %v303_v37 = vpack.c.bf16 %v2574_v33, %v2571_v32  ;;  %v2588_v39 = vld [vmem:[%s2494_s30 + $0x58] sm:$0xff]  ;;  %v2591_v40 = vld [vmem:[%s2494_s30 + $0x150] sm:$0xff]  ;;  %v2597_v42 = vld [vmem:[%s2494_s30 + $0x60] sm:$0xff] }
  0x78   : > { %1827 = vmatprep.subr.bf16.mxu0 %v1993_v3  ;;  %1904 = vmatprep.subr.bf16.mxu1 %v1993_v3  ;;  %v2594_v41 = vld [vmem:[%s2494_s30 + $0x158] sm:$0xff]  ;;  %v2600_v43 = vld [vmem:[%s2494_s30 + $0x68] sm:$0xff]  ;;  %v2603_v44 = vld [vmem:[%s2494_s30 + $0x160] sm:$0xff]  ;;  %v288_v46 = vpack.c.bf16 %v2588_v39, %v2585_v38  ;;  %p2224_p2 = pnand %p2223_p12, %p2217_p3 }
  0x79   : > { %v2606_v45 = vld [vmem:[%s2494_s30 + $0x168] sm:$0xff]  ;;  %v304_v47 = vpack.c.bf16 %v2594_v41, %v2591_v40  ;;  %v289_v48 = vpack.c.bf16 %v2600_v43, %v2597_v42  ;;  %v2617_v50 = vld [vmem:[%s2494_s30 + $0x70] sm:$0xff]  ;;  %v2620_v51 = vld [vmem:[%s2494_s30 + $0x78] sm:$0xff] }
  0x7a   : > { %v305_v49 = vpack.c.bf16 %v2606_v45, %v2603_v44  ;;  %v2623_v52 = vld [vmem:[%s2494_s30 + $0x170] sm:$0xff]  ;;  %v2626_v53 = vld [vmem:[%s2494_s30 + $0x178] sm:$0xff]  ;;  %v2629_v54 = vld [vmem:[%s2494_s30 + $0x80] sm:$0xff]  ;;  %v290_v58 = vpack.c.bf16 %v2620_v51, %v2617_v50 }
  0x7b   : > { %1828 = vmatpush3.bf16.msra.mxu0 %v1993_v3  ;;  %1912 = vmatpush3.bf16.msra.mxu1 %v1993_v3  ;;  %v2632_v55 = vld [vmem:[%s2494_s30 + $0x88] sm:$0xff]  ;;  %v2635_v56 = vld [vmem:[%s2494_s30 + $0x180] sm:$0xff]  ;;  %v306_v59 = vpack.c.bf16 %v2626_v53, %v2623_v52  ;;  %v2649_v62 = vld [vmem:[%s2494_s30 + $0x90] sm:$0xff] }
  0x7c   : > { %1829 = vmatprep.subr.bf16.mxu0 %v1994_v10  ;;  %1905 = vmatprep.subr.bf16.mxu1 %v1994_v10  ;;  %v2638_v57 = vld [vmem:[%s2494_s30 + $0x188] sm:$0xff]  ;;  %v291_v60 = vpack.c.bf16 %v2632_v55, %v2629_v54  ;;  %v2652_v63 = vld [vmem:[%s2494_s30 + $0x98] sm:$0xff]  ;;  %v2655_v0 = vld [vmem:[%s2494_s30 + $0x190] sm:$0xff] }
  0x7d   : > { %v307_v61 = vpack.c.bf16 %v2638_v57, %v2635_v56  ;;  %v2658_v1 = vld [vmem:[%s2494_s30 + $0x198] sm:$0xff]  ;;  %v2661_v2 = vld [vmem:[%s2494_s30 + $0xa0] sm:$0xff]  ;;  %v2664_v3 = vld [vmem:[%s2494_s30 + $0xa8] sm:$0xff] }
  0x7e   : > { %v2667_v7 = vld [vmem:[%s2494_s30 + $0x1a0] sm:$0xff]  ;;  %v2670_v9 = vld [vmem:[%s2494_s30 + $0x1a8] sm:$0xff] }
  0x7f   : > { %1830 = vmatpush3.bf16.msra.mxu0 %v1994_v10  ;;  %1913 = vmatpush3.bf16.msra.mxu1 %v1994_v10  ;;  %v292_v10 = vpack.c.bf16 %v2652_v63, %v2649_v62 }
  0x80   : > { %1831 = vmatprep.subr.bf16.mxu0 %v1995_v11  ;;  %1906 = vmatprep.subr.bf16.mxu1 %v1995_v11 }
  0x83   : > { %1832 = vmatpush3.bf16.msra.mxu0 %v1995_v11  ;;  %1914 = vmatpush3.bf16.msra.mxu1 %v1995_v11  ;;  %v308_v11 = vpack.c.bf16 %v2658_v1, %v2655_v0 }
  0x84   : > { %1833 = vmatprep.subr.bf16.mxu0 %v1996_v12  ;;  %1907 = vmatprep.subr.bf16.mxu1 %v1996_v12 }
  0x87   : > { %1834 = vmatpush3.bf16.msra.mxu0 %v1996_v12  ;;  %1915 = vmatpush3.bf16.msra.mxu1 %v1996_v12  ;;  %v293_v12 = vpack.c.bf16 %v2664_v3, %v2661_v2 }
  0x88   : > { %1835 = vmatprep.subr.bf16.mxu0 %v1997_v13  ;;  %1908 = vmatprep.subr.bf16.mxu1 %v1997_v13 }
  0x8b   : > { %1836 = vmatpush3.bf16.msra.mxu0 %v1997_v13  ;;  %1916 = vmatpush3.bf16.msra.mxu1 %v1997_v13  ;;  %v309_v13 = vpack.c.bf16 %v2670_v9, %v2667_v7 }
  0x8e   : > { %1838 = vmatmul.mubr.bf16.vlgmr.msra.gmra.mrb[0].mxu0 %v284_v22  ;;  %1870 = vmatmul.mubr.bf16.vlgmr.msra.gmra.mrb[0].mxu1 %v300_v23  ;;  %v2681_v22 = vld [vmem:[%s2494_s30 + $0xb0] sm:$0xff]  ;;  %v2684_v23 = vld [vmem:[%s2494_s30 + $0xb8] sm:$0xff] }
  0x8f   : > { %1841 = vmatprep.mubr.bf16.mxu0 %v285_v24  ;;  %1873 = vmatprep.mubr.bf16.mxu1 %v301_v25  ;;  %v2687_v24 = vld [vmem:[%s2494_s30 + $0x1b0] sm:$0xff]  ;;  %v2690_v25 = vld [vmem:[%s2494_s30 + $0x1b8] sm:$0xff] }
  0x96   : > { %1842 = vmatmul.mubr.bf16.gmra.mrb[4].mxu0 %v286_v34  ;;  %1874 = vmatmul.mubr.bf16.gmra.mrb[4].mxu1 %v302_v35  ;;  %v2693_v34 = vld [vmem:[%s2494_s30 + $0xc0] sm:$0xff]  ;;  %v2696_v35 = vld [vmem:[%s2494_s30 + $0xc8] sm:$0xff] }
  0x97   : > { %1845 = vmatprep.mubr.bf16.mxu0 %v287_v36  ;;  %1877 = vmatprep.mubr.bf16.mxu1 %v303_v37  ;;  %3902 = vst [vmem:[#allocation12_spill] sm:$0xff] %v2693_v34  ;;  %3903 = vst [vmem:[#allocation13_spill] sm:$0xff] %v2696_v35  ;;  %v2699_v36 = vld [vmem:[%s2494_s30 + $0x1c0] sm:$0xff]  ;;  %v2702_v37 = vld [vmem:[%s2494_s30 + $0x1c8] sm:$0xff] }
  0x98   : > { %3904 = vst [vmem:[#allocation14_spill] sm:$0xff] %v2699_v36  ;;  %3905 = vst [vmem:[#allocation15_spill] sm:$0xff] %v2702_v37 }
  0x9e   : > { %1846 = vmatmul.mubr.bf16.gmra.mrb[8].mxu0 %v288_v46  ;;  %1878 = vmatmul.mubr.bf16.gmra.mrb[8].mxu1 %v304_v47  ;;  %v294_v46 = vpack.c.bf16 %v2684_v23, %v2681_v22  ;;  %v310_v47 = vpack.c.bf16 %v2690_v25, %v2687_v24 }
  0x9f   : > { %1849 = vmatprep.mubr.bf16.mxu0 %v289_v48  ;;  %1881 = vmatprep.mubr.bf16.mxu1 %v305_v49  ;;  %v295_v48 = vpack.c.bf16 %v2696_v35, %v2693_v34  ;;  %v311_v49 = vpack.c.bf16 %v2702_v37, %v2699_v36  ;;  %v2745_v36 = vld [vmem:[%s2494_s30 + $0xf0] sm:$0xff]  ;;  %v2748_v37 = vld [vmem:[%s2494_s30 + $0xf8] sm:$0xff] }
  0xa0   : > { %3914 = vst [vmem:[#allocation24_spill] sm:$0xff] %v2745_v36  ;;  %3915 = vst [vmem:[#allocation25_spill] sm:$0xff] %v2748_v37  ;;  %v2751_v34 = vld [vmem:[%s2494_s30 + $0x1f0] sm:$0xff]  ;;  %v2754_v35 = vld [vmem:[%s2494_s30 + $0x1f8] sm:$0xff] }
  0xa1   : > { %3916 = vst [vmem:[#allocation26_spill] sm:$0xff] %v2751_v34  ;;  %3917 = vst [vmem:[#allocation27_spill] sm:$0xff] %v2754_v35 }
  0xa6   : > { %1850 = vmatmul.mubr.bf16.gmra.mrb[12].mxu0 %v290_v58  ;;  %1882 = vmatmul.mubr.bf16.gmra.mrb[12].mxu1 %v306_v59  ;;  %v2713_v58 = vld [vmem:[%s2494_s30 + $0xd0] sm:$0xff]  ;;  %v2716_v59 = vld [vmem:[%s2494_s30 + $0xd8] sm:$0xff] }
  0xa7   : > { %1853 = vmatprep.mubr.bf16.mxu0 %v291_v60  ;;  %1885 = vmatprep.mubr.bf16.mxu1 %v307_v61  ;;  %3906 = vst [vmem:[#allocation16_spill] sm:$0xff] %v2713_v58  ;;  %3907 = vst [vmem:[#allocation17_spill] sm:$0xff] %v2716_v59  ;;  %v2719_v60 = vld [vmem:[%s2494_s30 + $0x1d0] sm:$0xff]  ;;  %v2722_v61 = vld [vmem:[%s2494_s30 + $0x1d8] sm:$0xff] }
  0xa8   : > { %3908 = vst [vmem:[#allocation18_spill] sm:$0xff] %v2719_v60  ;;  %3909 = vst [vmem:[#allocation19_spill] sm:$0xff] %v2722_v61 }
  0xae   : > { %1854 = vmatmul.mubr.bf16.gmra.mrb[16].mxu0 %v292_v10  ;;  %1886 = vmatmul.mubr.bf16.gmra.mrb[16].mxu1 %v308_v11  ;;  %v2725_v10 = vld [vmem:[%s2494_s30 + $0xe0] sm:$0xff]  ;;  %v2728_v11 = vld [vmem:[%s2494_s30 + $0xe8] sm:$0xff] }
  0xaf   : > { %1857 = vmatprep.mubr.bf16.mxu0 %v293_v12  ;;  %1889 = vmatprep.mubr.bf16.mxu1 %v309_v13  ;;  %3910 = vst [vmem:[#allocation20_spill] sm:$0xff] %v2725_v10  ;;  %3911 = vst [vmem:[#allocation21_spill] sm:$0xff] %v2728_v11  ;;  %v2731_v12 = vld [vmem:[%s2494_s30 + $0x1e0] sm:$0xff]  ;;  %v2734_v13 = vld [vmem:[%s2494_s30 + $0x1e8] sm:$0xff] }
  0xb0   : > { %3912 = vst [vmem:[#allocation22_spill] sm:$0xff] %v2731_v12  ;;  %3913 = vst [vmem:[#allocation23_spill] sm:$0xff] %v2734_v13 }
  0xb6   : > { %1858 = vmatmul.mubr.bf16.gmra.mrb[20].mxu0 %v294_v46  ;;  %1890 = vmatmul.mubr.bf16.gmra.mrb[20].mxu1 %v310_v47  ;;  %v296_v46 = vpack.c.bf16 %v2716_v59, %v2713_v58  ;;  %v312_v47 = vpack.c.bf16 %v2722_v61, %v2719_v60  ;;  %v298_v60 = vpack.c.bf16 %v2748_v37, %v2745_v36 }
  0xb7   : > { %1861 = vmatprep.mubr.bf16.mxu0 %v295_v48  ;;  %1893 = vmatprep.mubr.bf16.mxu1 %v311_v49  ;;  %v297_v48 = vpack.c.bf16 %v2728_v11, %v2725_v10  ;;  %v313_v49 = vpack.c.bf16 %v2734_v13, %v2731_v12  ;;  %v314_v10 = vpack.c.bf16 %v2754_v35, %v2751_v34 }
  0xbe   : > { %1862 = vmatmul.mubr.bf16.gmra.mrb[24].mxu0 %v296_v46  ;;  %1894 = vmatmul.mubr.bf16.gmra.mrb[24].mxu1 %v312_v47  ;;  %v2760_v46 = vld [vmem:[#allocation7] ss:$0 sm:$0xff] }
  0xbf   : > { %1865 = vmatprep.mubr.bf16.mxu0 %v297_v48  ;;  %1897 = vmatprep.mubr.bf16.mxu1 %v313_v49 }
  0xc6   : > { %1866 = vmatmul.mubr.bf16.gmra.mrb[28].mxu0 %v298_v60  ;;  %1898 = vmatmul.mubr.bf16.gmra.mrb[28].mxu1 %v314_v10 }
 0x161   : > { %v1839_v47 = vpop.f32.mrb[0].mxu0  ;;  %v1871_v12 = vpop.f32.mrb[0].mxu1 }
 0x162   : > { %v427_v48 = vadd.f32 %v1839_v47, %v2760_v46  ;;  %v555_v49 = vadd.f32 %v1871_v12, %v2760_v46  ;;  %v418_v13 = vpop.f32.mrb[1].mxu0  ;;  %v546_v11 = vpop.f32.mrb[1].mxu1 }
 0x163   : > { %v1840_v61 = vpop.f32.mrb[2].mxu0  ;;  %v1872_v58 = vpop.f32.mrb[2].mxu1  ;;  %v419_v59 = vadd.f32 %v2760_v46, %v418_v13  ;;  %v547_v12 = vadd.f32 %v2760_v46, %v546_v11 }
 0x164   : > { %v430_v36 = vadd.f32 %v1840_v61, %v2760_v46  ;;  %v421_v37 = vpop.f32.mrb[3].mxu0  ;;  %v549_v34 = vpop.f32.mrb[3].mxu1  ;;  %v2767_v60 = vadd.f32 %v555_v49, %v2527_v16  ;;  %v2770_v10 = vadd.f32 %v427_v48, %v2521_v14  ;;  %v558_v47 = vadd.f32 %v1872_v58, %v2760_v46 }
 0x165   : > { %v2780_v61 = vadd.f32 %v419_v59, %v2505_v4  ;;  %v422_v11 = vadd.f32 %v2760_v46, %v421_v37  ;;  %v550_v58 = vadd.f32 %v2760_v46, %v549_v34  ;;  %v2790_v4 = vadd.f32 %v547_v12, %v2511_v6 }
 0x166   : > { %3918 = vst [vmem:[#allocation28_spill] sm:$0xff] %v2767_v60  ;;  %3919 = vst [vmem:[#allocation29_spill] sm:$0xff] %v2770_v10  ;;  %805 = vadd.xlane.f32.xlu0 %v2767_v60  ;;  %741 = vadd.xlane.f32.xlu1 %v2770_v10  ;;  %v2777_v13 = vadd.f32 %v430_v36, %v2524_v15  ;;  %v2787_v15 = vadd.f32 %v558_v47, %v2530_v17 }
 0x167   : > { %3921 = vst [vmem:[#allocation31_spill] sm:$0xff] %v2780_v61  ;;  %3923 = vst [vmem:[#allocation33_spill] sm:$0xff] %v2790_v4  ;;  %v2797_v37 = vadd.f32 %v550_v58, %v2516_v8  ;;  %v2800_v34 = vadd.f32 %v422_v11, %v2508_v5 }
 0x168   : > { %3920 = vst [vmem:[#allocation30_spill] sm:$0xff] %v2777_v13  ;;  %3922 = vst [vmem:[#allocation32_spill] sm:$0xff] %v2787_v15 }
 0x169   : > { %v1843_v35 = vpop.f32.mrb[4].mxu0  ;;  %v1875_v16 = vpop.f32.mrb[4].mxu1  ;;  %3924 = vst [vmem:[#allocation34_spill] sm:$0xff] %v2797_v37  ;;  %3925 = vst [vmem:[#allocation35_spill] sm:$0xff] %v2800_v34 }
 0x16a   : > { %743 = vadd.xlane.f32.xlu1 %v2777_v13  ;;  %737 = vadd.xlane.f32.xlu0 %v2780_v61  ;;  %v434_v14 = vpop.f32.mrb[5].mxu0  ;;  %v562_v48 = vpop.f32.mrb[5].mxu1  ;;  %v443_v61 = vadd.f32 %v1843_v35, %v2760_v46  ;;  %v571_v35 = vadd.f32 %v1875_v16, %v2760_v46 }
 0x16b   : > { %v1844_v49 = vpop.f32.mrb[6].mxu0  ;;  %v1876_v60 = vpop.f32.mrb[6].mxu1 }
 0x16c   : > { %v437_v36 = vpop.f32.mrb[7].mxu0  ;;  %v565_v59 = vpop.f32.mrb[7].mxu1  ;;  %v446_v13 = vadd.f32 %v1844_v49, %v2760_v46  ;;  %v574_v49 = vadd.f32 %v1876_v60, %v2760_v46  ;;  %v2812_v5 = vadd.f32 %v443_v61, %v2553_v26 }
 0x16e   : > { %807 = vadd.xlane.f32.xlu1 %v2787_v15  ;;  %801 = vadd.xlane.f32.xlu0 %v2790_v4  ;;  %v2809_v8 = vadd.f32 %v446_v13, %v2556_v27  ;;  %3927 = vst [vmem:[#allocation37_spill] sm:$0xff] %v2812_v5  ;;  %v2821_v16 = vadd.f32 %v574_v49, %v2562_v29 }
 0x16f   : > { %v2824_v27 = vadd.f32 %v571_v35, %v2559_v28  ;;  %v563_v29 = vadd.f32 %v2760_v46, %v562_v48  ;;  %v566_v28 = vadd.f32 %v2760_v46, %v565_v59 }
 0x170   : > { %3926 = vst [vmem:[#allocation36_spill] sm:$0xff] %v2809_v8  ;;  %3928 = vst [vmem:[#allocation38_spill] sm:$0xff] %v2821_v16 }
 0x171   : > { %v1847_v17 = vpop.f32.mrb[8].mxu0  ;;  %v1879_v47 = vpop.f32.mrb[8].mxu1  ;;  %3929 = vst [vmem:[#allocation39_spill] sm:$0xff] %v2824_v27  ;;  %v2857_v59 = vadd.f32 %v566_v28, %v2542_v21 }
 0x172   : > { %803 = vadd.xlane.f32.xlu1 %v2797_v37  ;;  %739 = vadd.xlane.f32.xlu0 %v2800_v34  ;;  %v450_v6 = vpop.f32.mrb[9].mxu0  ;;  %v2804_v12 = vpop.f32.mrb[9].mxu1  ;;  %v435_v37 = vadd.f32 %v2760_v46, %v434_v14  ;;  %v438_v34 = vadd.f32 %v2760_v46, %v437_v36  ;;  %v587_v21 = vadd.f32 %v1879_v47, %v2760_v46 }
 0x173   : > { %v1848_v4 = vpop.f32.mrb[10].mxu0  ;;  %v1880_v15 = vpop.f32.mrb[10].mxu1  ;;  %3932 = vst [vmem:[#allocation42_spill] sm:$0xff] %v2857_v59 }
 0x174   : > { %v453_v11 = vpop.f32.mrb[11].mxu0  ;;  %v2814_v58 = vpop.f32.mrb[11].mxu1  ;;  %v2843_v35 = vadd.f32 %v438_v34, %v2536_v19  ;;  %v2846_v49 = vadd.f32 %v435_v37, %v2533_v18  ;;  %v462_v48 = vadd.f32 %v1848_v4, %v2760_v46  ;;  %v2860_v19 = vadd.f32 %v563_v29, %v2539_v20 }
 0x175   : > { %v590_v28 = vadd.f32 %v1880_v15, %v2760_v46 }
 0x176   : > { %751 = vadd.xlane.f32.xlu1 %v2809_v8  ;;  %749 = vadd.xlane.f32.xlu0 %v2812_v5  ;;  %3930 = vst [vmem:[#allocation40_spill] sm:$0xff] %v2843_v35  ;;  %3931 = vst [vmem:[#allocation41_spill] sm:$0xff] %v2846_v49  ;;  %v459_v8 = vadd.f32 %v1847_v17, %v2760_v46 }
 0x177   : > { %3933 = vst [vmem:[#allocation43_spill] sm:$0xff] %v2860_v19 }
 0x179   : > { %v2826_v60 = vpop.f32.mrb[12].mxu0  ;;  %v2828_v26 = vpop.f32.mrb[12].mxu1 }
 0x17a   : > { %815 = vadd.xlane.f32.xlu1 %v2821_v16  ;;  %813 = vadd.xlane.f32.xlu0 %v2824_v27  ;;  %v2832_v13 = vpop.f32.mrb[13].mxu0  ;;  %v2834_v61 = vpop.f32.mrb[13].mxu1 }
 0x17b   : > { %v2836_v14 = vpop.f32.mrb[14].mxu0  ;;  %v2838_v36 = vpop.f32.mrb[14].mxu1 }
 0x17c   : > { %v2848_v16 = vpop.f32.mrb[15].mxu0  ;;  %v2850_v27 = vpop.f32.mrb[15].mxu1 }
 0x17e   : > { %747 = vadd.xlane.f32.xlu1 %v2843_v35  ;;  %745 = vadd.xlane.f32.xlu0 %v2846_v49  ;;  %v2882_v49 = vadd.f32 %v459_v8, %v2585_v38  ;;  %v451_v38 = vadd.f32 %v2760_v46, %v450_v6  ;;  %v2901_v8 = vadd.f32 %v590_v28, %v2594_v41 }
 0x17f   : > { %v579_v41 = vadd.f32 %v2760_v46, %v2804_v12 }
 0x180   : > { %3935 = vst [vmem:[#allocation45_spill] sm:$0xff] %v2882_v49  ;;  %3936 = vst [vmem:[#allocation46_spill] sm:$0xff] %v2901_v8 }
 0x181   : > { %v1855_v18 = vpop.f32.mrb[16].mxu0  ;;  %v1887_v37 = vpop.f32.mrb[16].mxu1 }
 0x182   : > { %811 = vadd.xlane.f32.xlu1 %v2857_v59  ;;  %809 = vadd.xlane.f32.xlu0 %v2860_v19  ;;  %v2865_v34 = vadd.f32 %v1855_v18, %v2760_v46  ;;  %v482_v35 = vpop.f32.mrb[17].mxu0  ;;  %v2868_v17 = vadd.f32 %v1887_v37, %v2760_v46  ;;  %v610_v4 = vpop.f32.mrb[17].mxu1  ;;  %v2879_v18 = vadd.f32 %v462_v48, %v2588_v39 }
 0x183   : > { %v2873_v20 = vadd.f32 %v2760_v46, %v482_v35  ;;  %v1856_v29 = vpop.f32.mrb[18].mxu0  ;;  %v2876_v59 = vadd.f32 %v2760_v46, %v610_v4  ;;  %v1888_v19 = vpop.f32.mrb[18].mxu1  ;;  %v454_v39 = vadd.f32 %v2760_v46, %v453_v11  ;;  %v2904_v48 = vadd.f32 %v587_v21, %v2591_v40 }
 0x184   : > { %3934 = vst [vmem:[#allocation44_spill] sm:$0xff] %v2879_v18  ;;  %v2885_v37 = vadd.f32 %v1856_v29, %v2760_v46  ;;  %v485_v47 = vpop.f32.mrb[19].mxu0  ;;  %v2888_v15 = vadd.f32 %v1888_v19, %v2760_v46  ;;  %v613_v35 = vpop.f32.mrb[19].mxu1  ;;  %v582_v40 = vadd.f32 %v2760_v46, %v2814_v58 }
 0x185   : > { %v2891_v5 = vadd.f32 %v2760_v46, %v485_v47  ;;  %v2894_v4 = vadd.f32 %v2760_v46, %v613_v35  ;;  %3937 = vst [vmem:[#allocation47_spill] sm:$0xff] %v2904_v48 }
 0x186   : > { %759 = vadd.xlane.f32.xlu1 %v2879_v18  ;;  %757 = vadd.xlane.f32.xlu0 %v2882_v49 }
 0x189   : > { %v1859_v19 = vpop.f32.mrb[20].mxu0  ;;  %v1891_v29 = vpop.f32.mrb[20].mxu1 }
 0x18a   : > { %823 = vadd.xlane.f32.xlu1 %v2901_v8  ;;  %821 = vadd.xlane.f32.xlu0 %v2904_v48  ;;  %v2909_v47 = vadd.f32 %v1859_v19, %v2760_v46  ;;  %v498_v35 = vpop.f32.mrb[21].mxu0  ;;  %v2912_v6 = vadd.f32 %v1891_v29, %v2760_v46  ;;  %v626_v11 = vpop.f32.mrb[21].mxu1  ;;  %v2925_v48 = vadd.f32 %v454_v39, %v2568_v31 }
 0x18b   : > { %v2919_v21 = vadd.f32 %v2760_v46, %v498_v35  ;;  %v1860_v28 = vpop.f32.mrb[22].mxu0  ;;  %v2922_v8 = vadd.f32 %v2760_v46, %v626_v11  ;;  %v1892_v19 = vpop.f32.mrb[22].mxu1  ;;  %v2928_v29 = vadd.f32 %v451_v38, %v2565_v30  ;;  %v475_v30 = vadd.f32 %v2826_v60, %v2760_v46 }
 0x18c   : > { %3938 = vst [vmem:[#allocation48_spill] sm:$0xff] %v2925_v48  ;;  %v2931_v18 = vadd.f32 %v1860_v28, %v2760_v46  ;;  %v501_v12 = vpop.f32.mrb[23].mxu0  ;;  %v2934_v58 = vadd.f32 %v1892_v19, %v2760_v46  ;;  %v629_v35 = vpop.f32.mrb[23].mxu1  ;;  %v478_v31 = vadd.f32 %v2836_v14, %v2760_v46  ;;  %v2949_v38 = vadd.f32 %v582_v40, %v2574_v33 }
 0x18d   : > { %3939 = vst [vmem:[#allocation49_spill] sm:$0xff] %v2928_v29  ;;  %v2937_v49 = vadd.f32 %v2760_v46, %v501_v12  ;;  %v2940_v11 = vadd.f32 %v2760_v46, %v629_v35  ;;  %v2952_v39 = vadd.f32 %v579_v41, %v2571_v32  ;;  %v603_v33 = vadd.f32 %v2828_v26, %v2760_v46 }
 0x18e   : > { %755 = vadd.xlane.f32.xlu1 %v2925_v48  ;;  %753 = vadd.xlane.f32.xlu0 %v2928_v29  ;;  %3940 = vst [vmem:[#allocation50_spill] sm:$0xff] %v2949_v38  ;;  %v606_v32 = vadd.f32 %v2838_v36, %v2760_v46 }
 0x18f   : > { %3941 = vst [vmem:[#allocation51_spill] sm:$0xff] %v2952_v39 }
 0x191   : > { %v1863_v28 = vpop.f32.mrb[24].mxu0  ;;  %v1895_v19 = vpop.f32.mrb[24].mxu1 }
 0x192   : > { %819 = vadd.xlane.f32.xlu1 %v2949_v38  ;;  %817 = vadd.xlane.f32.xlu0 %v2952_v39  ;;  %v2957_v12 = vadd.f32 %v1863_v28, %v2760_v46  ;;  %v514_v35 = vpop.f32.mrb[25].mxu0  ;;  %v2960_v60 = vadd.f32 %v1895_v19, %v2760_v46  ;;  %v642_v14 = vpop.f32.mrb[25].mxu1  ;;  %v2973_v39 = vadd.f32 %v478_v31, %v2620_v51 }
 0x193   : > { %v2967_v41 = vadd.f32 %v2760_v46, %v514_v35  ;;  %v1864_v40 = vpop.f32.mrb[26].mxu0  ;;  %v2970_v38 = vadd.f32 %v2760_v46, %v642_v14  ;;  %v1896_v28 = vpop.f32.mrb[26].mxu1  ;;  %v2976_v19 = vadd.f32 %v475_v30, %v2617_v50  ;;  %v467_v50 = vadd.f32 %v2760_v46, %v2832_v13 }
 0x194   : > { %3942 = vst [vmem:[#allocation52_spill] sm:$0xff] %v2973_v39  ;;  %v2979_v48 = vadd.f32 %v1864_v40, %v2760_v46  ;;  %v517_v26 = vpop.f32.mrb[27].mxu0  ;;  %v2982_v36 = vadd.f32 %v1896_v28, %v2760_v46  ;;  %v645_v35 = vpop.f32.mrb[27].mxu1  ;;  %v470_v51 = vadd.f32 %v2760_v46, %v2848_v16  ;;  %v2997_v30 = vadd.f32 %v606_v32, %v2626_v53 }
 0x195   : > { %3943 = vst [vmem:[#allocation53_spill] sm:$0xff] %v2976_v19  ;;  %v2985_v29 = vadd.f32 %v2760_v46, %v517_v26  ;;  %v2988_v14 = vadd.f32 %v2760_v46, %v645_v35  ;;  %v3000_v31 = vadd.f32 %v603_v33, %v2623_v52  ;;  %v595_v53 = vadd.f32 %v2760_v46, %v2834_v61 }
 0x196   : > { %767 = vadd.xlane.f32.xlu1 %v2973_v39  ;;  %765 = vadd.xlane.f32.xlu0 %v2976_v19  ;;  %3944 = vst [vmem:[#allocation54_spill] sm:$0xff] %v2997_v30  ;;  %v598_v52 = vadd.f32 %v2760_v46, %v2850_v27 }
 0x197   : > { %3945 = vst [vmem:[#allocation55_spill] sm:$0xff] %v3000_v31 }
 0x199   : > { %v1867_v40 = vpop.f32.mrb[28].mxu0  ;;  %v1899_v28 = vpop.f32.mrb[28].mxu1 }
 0x19a   : > { %831 = vadd.xlane.f32.xlu1 %v2997_v30  ;;  %829 = vadd.xlane.f32.xlu0 %v3000_v31  ;;  %v3005_v26 = vadd.f32 %v1867_v40, %v2760_v46  ;;  %v530_v35 = vpop.f32.mrb[29].mxu0  ;;  %v3008_v13 = vadd.f32 %v1899_v28, %v2760_v46  ;;  %v658_v16 = vpop.f32.mrb[29].mxu1  ;;  %v3021_v31 = vadd.f32 %v470_v51, %v2600_v43  ;;  %v3961_v51 = vld [vmem:[#allocation22_spill] sm:$0xff] }
 0x19b   : > { %v3015_v33 = vadd.f32 %v2760_v46, %v530_v35  ;;  %v1868_v32 = vpop.f32.mrb[30].mxu0  ;;  %v3018_v30 = vadd.f32 %v2760_v46, %v658_v16  ;;  %v1900_v40 = vpop.f32.mrb[30].mxu1  ;;  %v3024_v28 = vadd.f32 %v467_v50, %v2597_v42  ;;  %v3037_v43 = vadd.f32 %v598_v52, %v2606_v45 }
 0x19c   : > { %v542_v39 = vadd.f32 %v1868_v32, %v2760_v46  ;;  %v533_v61 = vpop.f32.mrb[31].mxu0  ;;  %v670_v19 = vadd.f32 %v1900_v40, %v2760_v46  ;;  %v661_v27 = vpop.f32.mrb[31].mxu1  ;;  %v3040_v42 = vadd.f32 %v595_v53, %v2603_v44  ;;  %v3046_v50 = vadd.f32 %v2885_v37, %v2652_v63 }
 0x19d   : > { %v3029_v35 = vadd.f32 %v2760_v46, %v533_v61  ;;  %v3032_v10 = vadd.f32 %v2760_v46, %v661_v27  ;;  %v3050_v46 = vadd.f32 %v2865_v34, %v2649_v62  ;;  %v3056_v44 = vadd.f32 %v2888_v15, %v2658_v1  ;;  %v3952_v15 = vld [vmem:[#allocation15_spill] sm:$0xff]  ;;  %v3963_v27 = vld [vmem:[#allocation28_spill] sm:$0xff] }
 0x19e   : > { %763 = vadd.xlane.f32.xlu1 %v3021_v31  ;;  %761 = vadd.xlane.f32.xlu0 %v3024_v28  ;;  %v3060_v45 = vadd.f32 %v2868_v17, %v2655_v0  ;;  %v3066_v62 = vadd.f32 %v2891_v5, %v2632_v55  ;;  %v3070_v63 = vadd.f32 %v2873_v20, %v2629_v54  ;;  %v3947_v5 = vld [vmem:[#allocation16_spill] sm:$0xff]  ;;  %v3950_v17 = vld [vmem:[#allocation13_spill] sm:$0xff] }
 0x19f   : > { %v3076_v0 = vadd.f32 %v2894_v4, %v2638_v57  ;;  %v3080_v1 = vadd.f32 %v2876_v59, %v2635_v56  ;;  %v3086_v54 = vadd.f32 %v2931_v18, %v2684_v23  ;;  %v3090_v55 = vadd.f32 %v2909_v47, %v2681_v22  ;;  %v3949_v59 = vld [vmem:[#allocation18_spill] sm:$0xff]  ;;  %v3951_v18 = vld [vmem:[#allocation12_spill] sm:$0xff]  ;;  %v3954_v47 = vld [vmem:[#allocation25_spill] sm:$0xff] }
 0x1a0   : > { %v3096_v56 = vadd.f32 %v2934_v58, %v2690_v25  ;;  %v3100_v57 = vadd.f32 %v2912_v6, %v2687_v24  ;;  %v3106_v22 = vadd.f32 %v2937_v49, %v2664_v3  ;;  %v3110_v23 = vadd.f32 %v2919_v21, %v2661_v2  ;;  %v3946_v3 = vld [vmem:[#allocation17_spill] sm:$0xff]  ;;  %v3955_v21 = vld [vmem:[#allocation24_spill] sm:$0xff]  ;;  %v3956_v58 = vld [vmem:[#allocation27_spill] sm:$0xff] }
 0x1a1   : > { %v3116_v24 = vadd.f32 %v2940_v11, %v2670_v9  ;;  %v3120_v25 = vadd.f32 %v2922_v8, %v2667_v7  ;;  %v3126_v2 = vadd.f32 %v2979_v48, %v3946_v3  ;;  %v3130_v49 = vadd.f32 %v2957_v12, %v3947_v5  ;;  %v3948_v9 = vld [vmem:[#allocation19_spill] sm:$0xff]  ;;  %v3953_v8 = vld [vmem:[#allocation14_spill] sm:$0xff] }
 0x1a2   : > { %827 = vadd.xlane.f32.xlu1 %v3037_v43  ;;  %825 = vadd.xlane.f32.xlu0 %v3040_v42  ;;  %v3136_v7 = vadd.f32 %v2982_v36, %v3948_v9  ;;  %v3140_v34 = vadd.f32 %v2960_v60, %v3949_v59  ;;  %v3146_v20 = vadd.f32 %v2985_v29, %v3950_v17  ;;  %v3964_v5 = vld [vmem:[#allocation30_spill] sm:$0xff] }
 0x1a3   : > { %v3150_v37 = vadd.f32 %v2967_v41, %v3951_v18  ;;  %v3156_v4 = vadd.f32 %v2988_v14, %v3952_v15  ;;  %v3160_v48 = vadd.f32 %v2970_v38, %v3953_v8  ;;  %v3165_v6 = vadd.f32 %v542_v39, %v3954_v47  ;;  %v3957_v38 = vld [vmem:[#allocation26_spill] sm:$0xff]  ;;  %v3958_v39 = vld [vmem:[#allocation21_spill] sm:$0xff]  ;;  %v3959_v41 = vld [vmem:[#allocation20_spill] sm:$0xff] }
 0x1a4   : > { %v3169_v29 = vadd.f32 %v3005_v26, %v3955_v21  ;;  %v3174_v11 = vadd.f32 %v670_v19, %v3956_v58  ;;  %v3178_v12 = vadd.f32 %v3008_v13, %v3957_v38  ;;  %v3184_v60 = vadd.f32 %v3029_v35, %v3958_v39  ;;  %v3960_v19 = vld [vmem:[#allocation23_spill] sm:$0xff]  ;;  %v3966_v38 = vld [vmem:[#allocation32_spill] sm:$0xff] }
 0x1a5   : > { %v3188_v36 = vadd.f32 %v3015_v33, %v3959_v41  ;;  %v3194_v14 = vadd.f32 %v3032_v10, %v3960_v19  ;;  %v3198_v26 = vadd.f32 %v3018_v30, %v3961_v51  ;;  %v3962_v33 = vld [vmem:[#allocation29_spill] sm:$0xff]  ;;  %v3965_v21 = vld [vmem:[#allocation31_spill] sm:$0xff] }
 0x1a6   : > { %775 = vadd.xlane.f32.xlu1 %v3046_v50  ;;  %773 = vadd.xlane.f32.xlu0 %v3050_v46  ;;  %v3967_v51 = vld [vmem:[#allocation33_spill] sm:$0xff] }
 0x1aa   : > { %839 = vadd.xlane.f32.xlu1 %v3056_v44  ;;  %837 = vadd.xlane.f32.xlu0 %v3060_v45 }
 0x1ae   : > { %771 = vadd.xlane.f32.xlu1 %v3066_v62  ;;  %769 = vadd.xlane.f32.xlu0 %v3070_v63 }
 0x1b2   : > { %835 = vadd.xlane.f32.xlu1 %v3076_v0  ;;  %833 = vadd.xlane.f32.xlu0 %v3080_v1 }
 0x1b6   : > { %783 = vadd.xlane.f32.xlu1 %v3086_v54  ;;  %781 = vadd.xlane.f32.xlu0 %v3090_v55 }
 0x1ba   : > { %847 = vadd.xlane.f32.xlu1 %v3096_v56  ;;  %845 = vadd.xlane.f32.xlu0 %v3100_v57 }
 0x1be   : > { %779 = vadd.xlane.f32.xlu1 %v3106_v22  ;;  %777 = vadd.xlane.f32.xlu0 %v3110_v23 }
 0x1c2   : > { %843 = vadd.xlane.f32.xlu1 %v3116_v24  ;;  %841 = vadd.xlane.f32.xlu0 %v3120_v25 }
 0x1c6   : > { %791 = vadd.xlane.f32.xlu1 %v3126_v2  ;;  %789 = vadd.xlane.f32.xlu0 %v3130_v49 }
 0x1ca   : > { %855 = vadd.xlane.f32.xlu1 %v3136_v7  ;;  %853 = vadd.xlane.f32.xlu0 %v3140_v34 }
 0x1ce   : > { %787 = vadd.xlane.f32.xlu1 %v3146_v20  ;;  %785 = vadd.xlane.f32.xlu0 %v3150_v37 }
 0x1d2   : > { %851 = vadd.xlane.f32.xlu1 %v3156_v4  ;;  %849 = vadd.xlane.f32.xlu0 %v3160_v48 }
 0x1d6   : > { %799 = vadd.xlane.f32.xlu1 %v3165_v6  ;;  %797 = vadd.xlane.f32.xlu0 %v3169_v29 }
 0x1da   : > { %863 = vadd.xlane.f32.xlu1 %v3174_v11  ;;  %861 = vadd.xlane.f32.xlu0 %v3178_v12 }
 0x1de   : > { %795 = vadd.xlane.f32.xlu1 %v3184_v60  ;;  %793 = vadd.xlane.f32.xlu0 %v3188_v36 }
 0x1e2   : > { %859 = vadd.xlane.f32.xlu1 %v3194_v14  ;;  %857 = vadd.xlane.f32.xlu0 %v3198_v26 }
 0x1f3   : > { %v806_v13 = vpop.xlane.xlu0 %805  ;;  %v742_v16 = vpop.xlane.xlu1 %741 }
 0x1f4   : > { %v900_v53 = vmul.f32 0.0078125, %v806_v13  ;;  %v868_v52 = vmul.f32 0.0078125, %v742_v16 }
 0x1f6   : > { %v3203_v32 = vsub.f32 %v3962_v33, %v868_v52  ;;  %v3206_v10 = vsub.f32 %v3963_v27, %v900_v53 }
 0x1f7   : > { %v744_v40 = vpop.xlane.xlu1 %743  ;;  %v738_v61 = vpop.xlane.xlu0 %737 }
 0x1f8   : > { %v869_v35 = vmul.f32 0.0078125, %v744_v40  ;;  %v866_v3 = vmul.f32 0.0078125, %v738_v61  ;;  %v996_v30 = vmul.f32 %v3203_v32, %v3203_v32  ;;  %v1028_v18 = vmul.f32 %v3206_v10, %v3206_v10  ;;  %v3968_v40 = vld [vmem:[#allocation35_spill] sm:$0xff] }
 0x1fa   : > { %1062 = vadd.xlane.f32.xlu0 %v996_v30  ;;  %v3211_v9 = vsub.f32 %v3964_v5, %v869_v35  ;;  %v3218_v58 = vsub.f32 %v3965_v21, %v866_v3 }
 0x1fb   : > { %v808_v59 = vpop.xlane.xlu1 %807  ;;  %v802_v17 = vpop.xlane.xlu0 %801 }
 0x1fc   : > { %v901_v15 = vmul.f32 0.0078125, %v808_v59  ;;  %v898_v8 = vmul.f32 0.0078125, %v802_v17  ;;  %v997_v47 = vmul.f32 %v3211_v9, %v3211_v9  ;;  %v994_v33 = vmul.f32 %v3218_v58, %v3218_v58  ;;  %v3969_v17 = vld [vmem:[#allocation34_spill] sm:$0xff] }
 0x1fe   : > { %1064 = vadd.xlane.f32.xlu1 %v997_v47  ;;  %1126 = vadd.xlane.f32.xlu0 %v1028_v18  ;;  %v3221_v39 = vsub.f32 %v3966_v38, %v901_v15  ;;  %v3224_v13 = vsub.f32 %v3967_v51, %v898_v8  ;;  %v3970_v15 = vld [vmem:[#allocation37_spill] sm:$0xff]  ;;  %v3971_v38 = vld [vmem:[#allocation36_spill] sm:$0xff] }
 0x1ff   : > { %v804_v41 = vpop.xlane.xlu1 %803  ;;  %v740_v19 = vpop.xlane.xlu0 %739 }
 0x200   : > { %v899_v16 = vmul.f32 0.0078125, %v804_v41  ;;  %v867_v53 = vmul.f32 0.0078125, %v740_v19  ;;  %v1029_v52 = vmul.f32 %v3221_v39, %v3221_v39  ;;  %v1026_v3 = vmul.f32 %v3224_v13, %v3224_v13 }
 0x202   : > { %1128 = vadd.xlane.f32.xlu1 %v1029_v52  ;;  %1058 = vadd.xlane.f32.xlu0 %v994_v33  ;;  %v3231_v61 = vsub.f32 %v3968_v40, %v867_v53  ;;  %v3238_v18 = vsub.f32 %v3969_v17, %v899_v16  ;;  %v3972_v16 = vld [vmem:[#allocation39_spill] sm:$0xff] }
 0x203   : > { %v752_v27 = vpop.xlane.xlu1 %751  ;;  %v750_v35 = vpop.xlane.xlu0 %749 }
 0x204   : > { %v873_v30 = vmul.f32 0.0078125, %v752_v27  ;;  %v872_v5 = vmul.f32 0.0078125, %v750_v35  ;;  %v995_v59 = vmul.f32 %v3231_v61, %v3231_v61  ;;  %v1027_v53 = vmul.f32 %v3238_v18, %v3238_v18 }
 0x206   : > { %1122 = vadd.xlane.f32.xlu0 %v1026_v3  ;;  %1060 = vadd.xlane.f32.xlu1 %v995_v59  ;;  %v3241_v8 = vsub.f32 %v3970_v15, %v872_v5  ;;  %v3244_v41 = vsub.f32 %v3971_v38, %v873_v30  ;;  %v3974_v59 = vld [vmem:[#allocation38_spill] sm:$0xff]  ;;  %v3976_v15 = vld [vmem:[#allocation41_spill] sm:$0xff] }
 0x207   : > { %v816_v47 = vpop.xlane.xlu1 %815  ;;  %v814_v21 = vpop.xlane.xlu0 %813 }
 0x208   : > { %v905_v19 = vmul.f32 0.0078125, %v816_v47  ;;  %v904_v51 = vmul.f32 0.0078125, %v814_v21  ;;  %v1000_v52 = vmul.f32 %v3241_v8, %v3241_v8  ;;  %v1001_v35 = vmul.f32 %v3244_v41, %v3244_v41 }
 0x20a   : > { %1124 = vadd.xlane.f32.xlu1 %v1027_v53  ;;  %1070 = vadd.xlane.f32.xlu0 %v1000_v52  ;;  %v3251_v33 = vsub.f32 %v3972_v16, %v904_v51  ;;  %v3258_v17 = vsub.f32 %v3974_v59, %v905_v19  ;;  %v3978_v51 = vld [vmem:[#allocation40_spill] sm:$0xff]  ;;  %v3980_v19 = vld [vmem:[#allocation43_spill] sm:$0xff] }
 0x20b   : > { %v748_v40 = vpop.xlane.xlu1 %747  ;;  %v746_v27 = vpop.xlane.xlu0 %745 }
 0x20c   : > { %3973 = vst [vmem:[#allocation17_spill] sm:$0xff] %v3251_v33  ;;  %v871_v3 = vmul.f32 0.0078125, %v748_v40  ;;  %v870_v30 = vmul.f32 0.0078125, %v746_v27  ;;  %v1032_v5 = vmul.f32 %v3251_v33, %v3251_v33  ;;  %3975 = vst [vmem:[#allocation16_spill] sm:$0xff] %v3258_v17  ;;  %v1033_v40 = vmul.f32 %v3258_v17, %v3258_v17 }
 0x20e   : > { %1072 = vadd.xlane.f32.xlu1 %v1001_v35  ;;  %1134 = vadd.xlane.f32.xlu0 %v1032_v5  ;;  %v3261_v47 = vsub.f32 %v3976_v15, %v870_v30  ;;  %v3264_v53 = vsub.f32 %v3978_v51, %v871_v3 }
 0x20f   : > { %v812_v21 = vpop.xlane.xlu1 %811  ;;  %v810_v38 = vpop.xlane.xlu0 %809 }
 0x210   : > { %3977 = vst [vmem:[#allocation19_spill] sm:$0xff] %v3261_v47  ;;  %3979 = vst [vmem:[#allocation18_spill] sm:$0xff] %v3264_v53  ;;  %v903_v52 = vmul.f32 0.0078125, %v812_v21  ;;  %v902_v16 = vmul.f32 0.0078125, %v810_v38  ;;  %v998_v27 = vmul.f32 %v3261_v47, %v3261_v47  ;;  %v999_v59 = vmul.f32 %v3264_v53, %v3264_v53  ;;  %v3982_v38 = vld [vmem:[#allocation42_spill] sm:$0xff]  ;;  %v3986_v47 = vld [vmem:[#allocation44_spill] sm:$0xff] }
 0x212   : > { %1136 = vadd.xlane.f32.xlu1 %v1033_v40  ;;  %1066 = vadd.xlane.f32.xlu0 %v998_v27  ;;  %v3271_v35 = vsub.f32 %v3980_v19, %v902_v16  ;;  %v3278_v51 = vsub.f32 %v3982_v38, %v903_v52  ;;  %v3984_v40 = vld [vmem:[#allocation45_spill] sm:$0xff]  ;;  %v3988_v52 = vld [vmem:[#allocation47_spill] sm:$0xff] }
 0x213   : > { %v760_v30 = vpop.xlane.xlu1 %759  ;;  %v758_v5 = vpop.xlane.xlu0 %757 }
 0x214   : > { %3981 = vst [vmem:[#allocation13_spill] sm:$0xff] %v3271_v35  ;;  %v877_v3 = vmul.f32 0.0078125, %v760_v30  ;;  %v876_v15 = vmul.f32 0.0078125, %v758_v5  ;;  %v1030_v21 = vmul.f32 %v3271_v35, %v3271_v35  ;;  %3983 = vst [vmem:[#allocation12_spill] sm:$0xff] %v3278_v51  ;;  %v1031_v30 = vmul.f32 %v3278_v51, %v3278_v51 }
 0x216   : > { %1068 = vadd.xlane.f32.xlu1 %v999_v59  ;;  %1130 = vadd.xlane.f32.xlu0 %v1030_v21  ;;  %v3281_v27 = vsub.f32 %v3984_v40, %v876_v15  ;;  %v3284_v17 = vsub.f32 %v3986_v47, %v877_v3 }
 0x217   : > { %v824_v16 = vpop.xlane.xlu1 %823  ;;  %v822_v19 = vpop.xlane.xlu0 %821 }
 0x218   : > { %3985 = vst [vmem:[#allocation15_spill] sm:$0xff] %v3281_v27  ;;  %3987 = vst [vmem:[#allocation14_spill] sm:$0xff] %v3284_v17  ;;  %v909_v33 = vmul.f32 0.0078125, %v824_v16  ;;  %v908_v53 = vmul.f32 0.0078125, %v822_v19  ;;  %v1004_v5 = vmul.f32 %v3281_v27, %v3281_v27  ;;  %v1005_v38 = vmul.f32 %v3284_v17, %v3284_v17  ;;  %v3990_v16 = vld [vmem:[#allocation46_spill] sm:$0xff]  ;;  %v3994_v27 = vld [vmem:[#allocation48_spill] sm:$0xff] }
 0x21a   : > { %1132 = vadd.xlane.f32.xlu1 %v1031_v30  ;;  %1078 = vadd.xlane.f32.xlu0 %v1004_v5  ;;  %v3291_v59 = vsub.f32 %v3988_v52, %v908_v53  ;;  %v3298_v19 = vsub.f32 %v3990_v16, %v909_v33  ;;  %v3992_v30 = vld [vmem:[#allocation49_spill] sm:$0xff]  ;;  %v3996_v33 = vld [vmem:[#allocation51_spill] sm:$0xff] }
 0x21b   : > { %v756_v15 = vpop.xlane.xlu1 %755  ;;  %v754_v21 = vpop.xlane.xlu0 %753 }
 0x21c   : > { %3989 = vst [vmem:[#allocation25_spill] sm:$0xff] %v3291_v59  ;;  %v875_v47 = vmul.f32 0.0078125, %v756_v15  ;;  %v874_v3 = vmul.f32 0.0078125, %v754_v21  ;;  %v1036_v40 = vmul.f32 %v3291_v59, %v3291_v59  ;;  %3991 = vst [vmem:[#allocation24_spill] sm:$0xff] %v3298_v19  ;;  %v1037_v15 = vmul.f32 %v3298_v19, %v3298_v19 }
 0x21e   : > { %1080 = vadd.xlane.f32.xlu1 %v1005_v38  ;;  %1142 = vadd.xlane.f32.xlu0 %v1036_v40  ;;  %v3301_v5 = vsub.f32 %v3992_v30, %v874_v3  ;;  %v3304_v51 = vsub.f32 %v3994_v27, %v875_v47 }
 0x21f   : > { %v820_v53 = vpop.xlane.xlu1 %819  ;;  %v818_v52 = vpop.xlane.xlu0 %817 }
 0x220   : > { %3993 = vst [vmem:[#allocation27_spill] sm:$0xff] %v3301_v5  ;;  %3995 = vst [vmem:[#allocation26_spill] sm:$0xff] %v3304_v51  ;;  %v907_v35 = vmul.f32 0.0078125, %v820_v53  ;;  %v906_v17 = vmul.f32 0.0078125, %v818_v52  ;;  %v1002_v21 = vmul.f32 %v3301_v5, %v3301_v5  ;;  %v1003_v16 = vmul.f32 %v3304_v51, %v3304_v51  ;;  %v3997_v53 = vld [vmem:[#allocation50_spill] sm:$0xff]  ;;  %v4000_v5 = vld [vmem:[#allocation52_spill] sm:$0xff] }
 0x222   : > { %1144 = vadd.xlane.f32.xlu1 %v1037_v15  ;;  %1074 = vadd.xlane.f32.xlu0 %v1002_v21  ;;  %v3311_v38 = vsub.f32 %v3996_v33, %v906_v17  ;;  %v3318_v52 = vsub.f32 %v3997_v53, %v907_v35  ;;  %v3998_v15 = vld [vmem:[#allocation53_spill] sm:$0xff]  ;;  %v4002_v35 = vld [vmem:[#allocation55_spill] sm:$0xff] }
 0x223   : > { %v768_v3 = vpop.xlane.xlu1 %767  ;;  %v766_v40 = vpop.xlane.xlu0 %765 }
 0x224   : > { %v881_v27 = vmul.f32 0.0078125, %v768_v3  ;;  %v880_v47 = vmul.f32 0.0078125, %v766_v40  ;;  %v1034_v30 = vmul.f32 %v3311_v38, %v3311_v38  ;;  %v1035_v3 = vmul.f32 %v3318_v52, %v3318_v52 }
 0x226   : > { %1076 = vadd.xlane.f32.xlu1 %v1003_v16  ;;  %1138 = vadd.xlane.f32.xlu0 %v1034_v30  ;;  %v3321_v21 = vsub.f32 %v3998_v15, %v880_v47  ;;  %v3324_v19 = vsub.f32 %v4000_v5, %v881_v27 }
 0x227   : > { %v832_v17 = vpop.xlane.xlu1 %831  ;;  %v830_v33 = vpop.xlane.xlu0 %829 }
 0x228   : > { %3999 = vst [vmem:[#allocation21_spill] sm:$0xff] %v3321_v21  ;;  %4001 = vst [vmem:[#allocation20_spill] sm:$0xff] %v3324_v19  ;;  %v913_v59 = vmul.f32 0.0078125, %v832_v17  ;;  %v912_v51 = vmul.f32 0.0078125, %v830_v33  ;;  %v1008_v40 = vmul.f32 %v3321_v21, %v3321_v21  ;;  %v1009_v53 = vmul.f32 %v3324_v19, %v3324_v19  ;;  %v4003_v17 = vld [vmem:[#allocation54_spill] sm:$0xff] }
 0x22a   : > { %1140 = vadd.xlane.f32.xlu1 %v1035_v3  ;;  %1086 = vadd.xlane.f32.xlu0 %v1008_v40  ;;  %v3331_v16 = vsub.f32 %v4002_v35, %v912_v51  ;;  %v3338_v33 = vsub.f32 %v4003_v17, %v913_v59 }
 0x22b   : > { %v764_v47 = vpop.xlane.xlu1 %763  ;;  %v762_v30 = vpop.xlane.xlu0 %761 }
 0x22c   : > { %v879_v5 = vmul.f32 0.0078125, %v764_v47  ;;  %v878_v27 = vmul.f32 0.0078125, %v762_v30  ;;  %v1040_v15 = vmul.f32 %v3331_v16, %v3331_v16  ;;  %v1041_v47 = vmul.f32 %v3338_v33, %v3338_v33 }
 0x22e   : > { %1088 = vadd.xlane.f32.xlu1 %v1009_v53  ;;  %1150 = vadd.xlane.f32.xlu0 %v1040_v15  ;;  %v3341_v3 = vsub.f32 %v3024_v28, %v878_v27  ;;  %v3344_v35 = vsub.f32 %v3021_v31, %v879_v5 }
 0x22f   : > { %v828_v51 = vpop.xlane.xlu1 %827  ;;  %v826_v40 = vpop.xlane.xlu0 %825 }
 0x230   : > { %v911_v21 = vmul.f32 0.0078125, %v828_v51  ;;  %v910_v19 = vmul.f32 0.0078125, %v826_v40  ;;  %v1006_v30 = vmul.f32 %v3341_v3, %v3341_v3  ;;  %v1007_v27 = vmul.f32 %v3344_v35, %v3344_v35 }
 0x232   : > { %v3351_v59 = vsub.f32 %v3040_v42, %v910_v19  ;;  %1152 = vadd.xlane.f32.xlu1 %v1041_v47  ;;  %1082 = vadd.xlane.f32.xlu0 %v1006_v30  ;;  %v3356_v31 = vsub.f32 %v3037_v43, %v911_v21 }
 0x233   : > { %v776_v28 = vpop.xlane.xlu1 %775  ;;  %v774_v53 = vpop.xlane.xlu0 %773 }
 0x234   : > { %v885_v5 = vmul.f32 0.0078125, %v776_v28  ;;  %v884_v15 = vmul.f32 0.0078125, %v774_v53  ;;  %v1038_v17 = vmul.f32 %v3351_v59, %v3351_v59  ;;  %v1039_v43 = vmul.f32 %v3356_v31, %v3356_v31 }
 0x236   : > { %v3361_v51 = vsub.f32 %v3050_v46, %v884_v15  ;;  %1084 = vadd.xlane.f32.xlu1 %v1007_v27  ;;  %1146 = vadd.xlane.f32.xlu0 %v1038_v17  ;;  %v3364_v42 = vsub.f32 %v3046_v50, %v885_v5 }
 0x237   : > { %v840_v19 = vpop.xlane.xlu1 %839  ;;  %v838_v40 = vpop.xlane.xlu0 %837 }
 0x238   : > { %v917_v47 = vmul.f32 0.0078125, %v840_v19  ;;  %v916_v30 = vmul.f32 0.0078125, %v838_v40  ;;  %v1012_v21 = vmul.f32 %v3361_v51, %v3361_v51  ;;  %v1013_v50 = vmul.f32 %v3364_v42, %v3364_v42 }
 0x23a   : > { %v3371_v28 = vsub.f32 %v3060_v45, %v916_v30  ;;  %1148 = vadd.xlane.f32.xlu1 %v1039_v43  ;;  %1094 = vadd.xlane.f32.xlu0 %v1012_v21  ;;  %v3376_v27 = vsub.f32 %v3056_v44, %v917_v47 }
 0x23b   : > { %v772_v46 = vpop.xlane.xlu1 %771  ;;  %v770_v53 = vpop.xlane.xlu0 %769 }
 0x23c   : > { %v883_v5 = vmul.f32 0.0078125, %v772_v46  ;;  %v882_v15 = vmul.f32 0.0078125, %v770_v53  ;;  %v1044_v17 = vmul.f32 %v3371_v28, %v3371_v28  ;;  %v1045_v44 = vmul.f32 %v3376_v27, %v3376_v27 }
 0x23e   : > { %v3381_v19 = vsub.f32 %v3070_v63, %v882_v15  ;;  %1096 = vadd.xlane.f32.xlu1 %v1013_v50  ;;  %1158 = vadd.xlane.f32.xlu0 %v1044_v17  ;;  %v3384_v45 = vsub.f32 %v3066_v62, %v883_v5 }
 0x23f   : > { %v836_v40 = vpop.xlane.xlu1 %835  ;;  %v834_v30 = vpop.xlane.xlu0 %833 }
 0x240   : > { %v915_v43 = vmul.f32 0.0078125, %v836_v40  ;;  %v914_v21 = vmul.f32 0.0078125, %v834_v30  ;;  %v1010_v47 = vmul.f32 %v3381_v19, %v3381_v19  ;;  %v1011_v62 = vmul.f32 %v3384_v45, %v3384_v45 }
 0x242   : > { %v3391_v46 = vsub.f32 %v3080_v1, %v914_v21  ;;  %1160 = vadd.xlane.f32.xlu1 %v1045_v44  ;;  %1090 = vadd.xlane.f32.xlu0 %v1010_v47  ;;  %v3396_v50 = vsub.f32 %v3076_v0, %v915_v43 }
 0x243   : > { %v784_v63 = vpop.xlane.xlu1 %783  ;;  %v782_v53 = vpop.xlane.xlu0 %781 }
 0x244   : > { %v889_v5 = vmul.f32 0.0078125, %v784_v63  ;;  %v888_v15 = vmul.f32 0.0078125, %v782_v53  ;;  %v1042_v17 = vmul.f32 %v3391_v46, %v3391_v46  ;;  %v1043_v0 = vmul.f32 %v3396_v50, %v3396_v50 }
 0x246   : > { %v3401_v40 = vsub.f32 %v3090_v55, %v888_v15  ;;  %1092 = vadd.xlane.f32.xlu1 %v1011_v62  ;;  %1154 = vadd.xlane.f32.xlu0 %v1042_v17  ;;  %v3404_v1 = vsub.f32 %v3086_v54, %v889_v5 }
 0x247   : > { %v848_v30 = vpop.xlane.xlu1 %847  ;;  %v846_v21 = vpop.xlane.xlu0 %845 }
 0x248   : > { %v921_v44 = vmul.f32 0.0078125, %v848_v30  ;;  %v920_v47 = vmul.f32 0.0078125, %v846_v21  ;;  %v1016_v43 = vmul.f32 %v3401_v40, %v3401_v40  ;;  %v1017_v54 = vmul.f32 %v3404_v1, %v3404_v1 }
 0x24a   : > { %v3411_v63 = vsub.f32 %v3100_v57, %v920_v47  ;;  %1156 = vadd.xlane.f32.xlu1 %v1043_v0  ;;  %1102 = vadd.xlane.f32.xlu0 %v1016_v43  ;;  %v3416_v62 = vsub.f32 %v3096_v56, %v921_v44 }
 0x24b   : > { %v780_v55 = vpop.xlane.xlu1 %779  ;;  %v778_v53 = vpop.xlane.xlu0 %777 }
 0x24c   : > { %v887_v5 = vmul.f32 0.0078125, %v780_v55  ;;  %v886_v15 = vmul.f32 0.0078125, %v778_v53  ;;  %v1048_v17 = vmul.f32 %v3411_v63, %v3411_v63  ;;  %v1049_v56 = vmul.f32 %v3416_v62, %v3416_v62 }
 0x24e   : > { %v3421_v30 = vsub.f32 %v3110_v23, %v886_v15  ;;  %1104 = vadd.xlane.f32.xlu1 %v1017_v54  ;;  %1166 = vadd.xlane.f32.xlu0 %v1048_v17  ;;  %v3424_v57 = vsub.f32 %v3106_v22, %v887_v5 }
 0x24f   : > { %v844_v21 = vpop.xlane.xlu1 %843  ;;  %v842_v47 = vpop.xlane.xlu0 %841 }
 0x250   : > { %v919_v0 = vmul.f32 0.0078125, %v844_v21  ;;  %v918_v43 = vmul.f32 0.0078125, %v842_v47  ;;  %v1014_v44 = vmul.f32 %v3421_v30, %v3421_v30  ;;  %v1015_v22 = vmul.f32 %v3424_v57, %v3424_v57 }
 0x252   : > { %v3431_v55 = vsub.f32 %v3120_v25, %v918_v43  ;;  %1168 = vadd.xlane.f32.xlu1 %v1049_v56  ;;  %1098 = vadd.xlane.f32.xlu0 %v1014_v44  ;;  %v3436_v54 = vsub.f32 %v3116_v24, %v919_v0 }
 0x253   : > { %v792_v23 = vpop.xlane.xlu1 %791  ;;  %v790_v53 = vpop.xlane.xlu0 %789 }
 0x254   : > { %v893_v5 = vmul.f32 0.0078125, %v792_v23  ;;  %v892_v15 = vmul.f32 0.0078125, %v790_v53  ;;  %v1046_v17 = vmul.f32 %v3431_v55, %v3431_v55  ;;  %v1047_v24 = vmul.f32 %v3436_v54, %v3436_v54 }
 0x256   : > { %v3441_v21 = vsub.f32 %v3130_v49, %v892_v15  ;;  %1100 = vadd.xlane.f32.xlu1 %v1015_v22  ;;  %1162 = vadd.xlane.f32.xlu0 %v1046_v17  ;;  %v3444_v25 = vsub.f32 %v3126_v2, %v893_v5 }
 0x257   : > { %v856_v47 = vpop.xlane.xlu1 %855  ;;  %v854_v43 = vpop.xlane.xlu0 %853 }
 0x258   : > { %v925_v56 = vmul.f32 0.0078125, %v856_v47  ;;  %v924_v44 = vmul.f32 0.0078125, %v854_v43  ;;  %v1020_v0 = vmul.f32 %v3441_v21, %v3441_v21  ;;  %v1021_v2 = vmul.f32 %v3444_v25, %v3444_v25 }
 0x25a   : > { %v3451_v23 = vsub.f32 %v3140_v34, %v924_v44  ;;  %1164 = vadd.xlane.f32.xlu1 %v1047_v24  ;;  %1110 = vadd.xlane.f32.xlu0 %v1020_v0  ;;  %v3456_v22 = vsub.f32 %v3136_v7, %v925_v56 }
 0x25b   : > { %v788_v49 = vpop.xlane.xlu1 %787  ;;  %v786_v53 = vpop.xlane.xlu0 %785 }
 0x25c   : > { %v891_v5 = vmul.f32 0.0078125, %v788_v49  ;;  %v890_v15 = vmul.f32 0.0078125, %v786_v53  ;;  %v1052_v17 = vmul.f32 %v3451_v23, %v3451_v23  ;;  %v1053_v7 = vmul.f32 %v3456_v22, %v3456_v22 }
 0x25e   : > { %v3461_v47 = vsub.f32 %v3150_v37, %v890_v15  ;;  %1112 = vadd.xlane.f32.xlu1 %v1021_v2  ;;  %1174 = vadd.xlane.f32.xlu0 %v1052_v17  ;;  %v3464_v34 = vsub.f32 %v3146_v20, %v891_v5 }
 0x25f   : > { %v852_v43 = vpop.xlane.xlu1 %851  ;;  %v850_v44 = vpop.xlane.xlu0 %849 }
 0x260   : > { %v923_v24 = vmul.f32 0.0078125, %v852_v43  ;;  %v922_v0 = vmul.f32 0.0078125, %v850_v44  ;;  %v1018_v56 = vmul.f32 %v3461_v47, %v3461_v47  ;;  %v1019_v20 = vmul.f32 %v3464_v34, %v3464_v34 }
 0x262   : > { %v3471_v49 = vsub.f32 %v3160_v48, %v922_v0  ;;  %1176 = vadd.xlane.f32.xlu1 %v1053_v7  ;;  %1106 = vadd.xlane.f32.xlu0 %v1018_v56  ;;  %v3476_v2 = vsub.f32 %v3156_v4, %v923_v24 }
 0x263   : > { %v800_v37 = vpop.xlane.xlu1 %799  ;;  %v798_v53 = vpop.xlane.xlu0 %797 }
 0x264   : > { %v897_v5 = vmul.f32 0.0078125, %v800_v37  ;;  %v896_v15 = vmul.f32 0.0078125, %v798_v53  ;;  %v1050_v17 = vmul.f32 %v3471_v49, %v3471_v49  ;;  %v1051_v7 = vmul.f32 %v3476_v2, %v3476_v2 }
 0x266   : > { %v3481_v43 = vsub.f32 %v3169_v29, %v896_v15  ;;  %1108 = vadd.xlane.f32.xlu1 %v1019_v20  ;;  %1170 = vadd.xlane.f32.xlu0 %v1050_v17  ;;  %v3484_v0 = vsub.f32 %v3165_v6, %v897_v5 }
 0x267   : > { %v864_v48 = vpop.xlane.xlu1 %863  ;;  %v862_v44 = vpop.xlane.xlu0 %861 }
 0x268   : > { %4004 = vst [vmem:[#allocation23_spill] sm:$0xff] %v3481_v43  ;;  %4005 = vst [vmem:[#allocation22_spill] sm:$0xff] %v3484_v0  ;;  %v1024_v4 = vmul.f32 %v3481_v43, %v3481_v43  ;;  %v1025_v53 = vmul.f32 %v3484_v0, %v3484_v0  ;;  %v929_v5 = vmul.f32 0.0078125, %v864_v48  ;;  %v928_v15 = vmul.f32 0.0078125, %v862_v44 }
 0x26a   : > { %1172 = vadd.xlane.f32.xlu1 %v1051_v7  ;;  %1118 = vadd.xlane.f32.xlu0 %v1024_v4  ;;  %v3512_v48 = vsub.f32 %v3178_v12, %v928_v15 }
 0x26b   : > { %v796_v24 = vpop.xlane.xlu1 %795  ;;  %v794_v56 = vpop.xlane.xlu0 %793 }
 0x26c   : > { %v895_v37 = vmul.f32 0.0078125, %v796_v24  ;;  %v894_v29 = vmul.f32 0.0078125, %v794_v56  ;;  %4007 = vst [vmem:[#allocation28_spill] sm:$0xff] %v3512_v48 }
 0x26e   : > { %v3493_v20 = vsub.f32 %v3184_v60, %v895_v37  ;;  %v3496_v6 = vsub.f32 %v3188_v36, %v894_v29  ;;  %1120 = vadd.xlane.f32.xlu1 %v1025_v53  ;;  %v3509_v36 = vsub.f32 %v3174_v11, %v929_v5 }
 0x26f   : > { %v860_v17 = vpop.xlane.xlu1 %859  ;;  %v858_v43 = vpop.xlane.xlu0 %857 }
 0x270   : > { %v927_v7 = vmul.f32 0.0078125, %v860_v17  ;;  %v926_v4 = vmul.f32 0.0078125, %v858_v43  ;;  %v1023_v24 = vmul.f32 %v3493_v20, %v3493_v20  ;;  %v1022_v56 = vmul.f32 %v3496_v6, %v3496_v6  ;;  %4006 = vst [vmem:[#allocation29_spill] sm:$0xff] %v3509_v36 }
 0x272   : > { %v3503_v0 = vsub.f32 %v3194_v14, %v927_v7  ;;  %v3506_v60 = vsub.f32 %v3198_v26, %v926_v4  ;;  %1116 = vadd.xlane.f32.xlu1 %v1023_v24  ;;  %1114 = vadd.xlane.f32.xlu0 %v1022_v56  ;;  %v1057_v14 = vmul.f32 %v3509_v36, %v3509_v36 }
 0x273   : > { %v1056_v26 = vmul.f32 %v3512_v48, %v3512_v48 }
 0x274   : > { %v1055_v43 = vmul.f32 %v3503_v0, %v3503_v0  ;;  %v1054_v44 = vmul.f32 %v3506_v60, %v3506_v60 }
 0x276   : > { %1180 = vadd.xlane.f32.xlu1 %v1055_v43  ;;  %1178 = vadd.xlane.f32.xlu0 %v1054_v44 }
 0x27a   : > { %1184 = vadd.xlane.f32.xlu1 %v1057_v14  ;;  %1182 = vadd.xlane.f32.xlu0 %v1056_v26 }
 0x287   : > { %v1063_v11 = vpop.xlane.xlu0 %1062 }
 0x288   : > { %v1188_v37 = vmul.f32 0.0078125, %v1063_v11 }
 0x28a   : > { %v1252_v12 = vadd.f32 1e-05, %v1188_v37 }
 0x28b   : > { %v1065_v29 = vpop.xlane.xlu1 %1064  ;;  %v1127_v53 = vpop.xlane.xlu0 %1126 }
 0x28c   : > { %1998 = vrsqrt.f32 %v1252_v12  ;;  %v1189_v5 = vmul.f32 0.0078125, %v1065_v29  ;;  %v1220_v15 = vmul.f32 0.0078125, %v1127_v53  ;;  %v3522_v12 = vld [vmem:[#allocation7 + $0x1] ss:$0 sm:$0xff] }
 0x28e   : > { %v1253_v17 = vadd.f32 1e-05, %v1189_v5  ;;  %v1284_v7 = vadd.f32 1e-05, %v1220_v15 }
 0x28f   : > { %v1129_v4 = vpop.xlane.xlu1 %1128  ;;  %v1059_v24 = vpop.xlane.xlu0 %1058 }
 0x290   : > { %2000 = vrsqrt.f32 %v1253_v17  ;;  %v1221_v56 = vmul.f32 0.0078125, %v1129_v4  ;;  %v1186_v43 = vmul.f32 0.0078125, %v1059_v24  ;;  %v3525_v4 = vld [vmem:[#allocation7 + $0x2] ss:$0 sm:$0xff] }
 0x291   : > { %2002 = vrsqrt.f32 %v1284_v7 }
 0x292   : > { %v1285_v44 = vadd.f32 1e-05, %v1221_v56  ;;  %v1250_v48 = vadd.f32 1e-05, %v1186_v43 }
 0x293   : > { %v1061_v14 = vpop.xlane.xlu1 %1060  ;;  %v1123_v26 = vpop.xlane.xlu0 %1122 }
 0x294   : > { %2004 = vrsqrt.f32 %v1285_v44  ;;  %v1187_v11 = vmul.f32 0.0078125, %v1061_v14  ;;  %v1218_v37 = vmul.f32 0.0078125, %v1123_v26 }
 0x295   : > { %2006 = vrsqrt.f32 %v1250_v48 }
 0x296   : > { %v1999_v36 = vpop.eup %1998  ;;  %v1251_v29 = vadd.f32 1e-05, %v1187_v11  ;;  %v1282_v53 = vadd.f32 1e-05, %v1218_v37 }
 0x297   : > { %v1380_v5 = vmul.f32 %v1999_v36, %v3203_v32  ;;  %v1125_v15 = vpop.xlane.xlu1 %1124  ;;  %v1071_v17 = vpop.xlane.xlu0 %1070 }
 0x298   : > { %2008 = vrsqrt.f32 %v1251_v29  ;;  %v1219_v7 = vmul.f32 0.0078125, %v1125_v15  ;;  %v1192_v24 = vmul.f32 0.0078125, %v1071_v17 }
 0x299   : > { %v1449_v56 = vmul.f32 %v3522_v12, %v1380_v5  ;;  %2010 = vrsqrt.f32 %v1282_v53 }
 0x29a   : > { %v2001_v43 = vpop.eup %2000  ;;  %v1283_v48 = vadd.f32 1e-05, %v1219_v7  ;;  %v1256_v44 = vadd.f32 1e-05, %v1192_v24 }
 0x29b   : > { %v2003_v14 = vpop.eup %2002  ;;  %v1518_v26 = vadd.f32 %v3525_v4, %v1449_v56  ;;  %v1381_v11 = vmul.f32 %v2001_v43, %v3211_v9  ;;  %v1073_v32 = vpop.xlane.xlu1 %1072 }
 0x29c   : > { %v1135_v36 = vpop.xlane.xlu0 %1134  ;;  %v1412_v37 = vmul.f32 %v2003_v14, %v3206_v10  ;;  %2012 = vrsqrt.f32 %v1283_v48  ;;  %v1193_v29 = vmul.f32 0.0078125, %v1073_v32 }
 0x29d   : > { %v1224_v15 = vmul.f32 0.0078125, %v1135_v36  ;;  %1582 = vst [vmem:[%s3533_s18 + $0x10] sm:$0xff] %v1518_v26  ;;  %v1450_v53 = vmul.f32 %v3522_v12, %v1381_v11  ;;  %2014 = vrsqrt.f32 %v1256_v44 }
 0x29e   : > { %v2005_v5 = vpop.eup %2004  ;;  %v1481_v17 = vmul.f32 %v3522_v12, %v1412_v37  ;;  %v1257_v9 = vadd.f32 1e-05, %v1193_v29 }
 0x29f   : > { %v1288_v7 = vadd.f32 1e-05, %v1224_v15  ;;  %v2007_v24 = vpop.eup %2006  ;;  %v1519_v10 = vadd.f32 %v3525_v4, %v1450_v53  ;;  %v1413_v56 = vmul.f32 %v2005_v5, %v3221_v39  ;;  %v1137_v43 = vpop.xlane.xlu1 %1136 }
 0x2a0   : > { %v1067_v48 = vpop.xlane.xlu0 %1066  ;;  %v1550_v14 = vadd.f32 %v3525_v4, %v1481_v17  ;;  %v1378_v26 = vmul.f32 %v2007_v24, %v3218_v58  ;;  %2016 = vrsqrt.f32 %v1257_v9  ;;  %v1225_v11 = vmul.f32 0.0078125, %v1137_v43 }
 0x2a1   : > { %1583 = vst [vmem:[%s3533_s18 + $0x18] sm:$0xff] %v1519_v10  ;;  %v1482_v44 = vmul.f32 %v3522_v12, %v1413_v56  ;;  %2018 = vrsqrt.f32 %v1288_v7  ;;  %v1190_v32 = vmul.f32 0.0078125, %v1067_v48 }
 0x2a2   : > { %v2009_v36 = vpop.eup %2008  ;;  %1614 = vst [vmem:[%s3533_s18 + $0x110] sm:$0xff] %v1550_v14  ;;  %v1447_v37 = vmul.f32 %v3522_v12, %v1378_v26  ;;  %v1289_v29 = vadd.f32 1e-05, %v1225_v11 }
 0x2a3   : > { %v2011_v39 = vpop.eup %2010  ;;  %v1551_v15 = vadd.f32 %v3525_v4, %v1482_v44  ;;  %v1379_v53 = vmul.f32 %v2009_v36, %v3231_v61  ;;  %v1254_v58 = vadd.f32 1e-05, %v1190_v32  ;;  %v1069_v5 = vpop.xlane.xlu1 %1068 }
 0x2a4   : > { %v1131_v17 = vpop.xlane.xlu0 %1130  ;;  %v1516_v9 = vadd.f32 %v3525_v4, %v1447_v37  ;;  %v1410_v7 = vmul.f32 %v2011_v39, %v3224_v13  ;;  %2020 = vrsqrt.f32 %v1289_v29  ;;  %v1191_v24 = vmul.f32 0.0078125, %v1069_v5 }
 0x2a5   : > { %1615 = vst [vmem:[%s3533_s18 + $0x118] sm:$0xff] %v1551_v15  ;;  %v1448_v10 = vmul.f32 %v3522_v12, %v1379_v53  ;;  %2022 = vrsqrt.f32 %v1254_v58  ;;  %v1222_v56 = vmul.f32 0.0078125, %v1131_v17 }
 0x2a6   : > { %v2013_v43 = vpop.eup %2012  ;;  %1580 = vst [vmem:[%s3533_s18] sm:$0xff] %v1516_v9  ;;  %v1479_v48 = vmul.f32 %v3522_v12, %v1410_v7  ;;  %v1255_v61 = vadd.f32 1e-05, %v1191_v24 }
 0x2a7   : > { %v2015_v14 = vpop.eup %2014  ;;  %v1517_v26 = vadd.f32 %v3525_v4, %v1448_v10  ;;  %v1411_v11 = vmul.f32 %v2013_v43, %v3238_v18  ;;  %v1286_v13 = vadd.f32 1e-05, %v1222_v56  ;;  %v1133_v44 = vpop.xlane.xlu1 %1132  ;;  %v4008_v56 = vld [vmem:[#allocation17_spill] sm:$0xff] }
 0x2a8   : > { %v1079_v32 = vpop.xlane.xlu0 %1078  ;;  %v1548_v36 = vadd.f32 %v3525_v4, %v1479_v48  ;;  %v1384_v37 = vmul.f32 %v2015_v14, %v3241_v8  ;;  %2024 = vrsqrt.f32 %v1255_v61  ;;  %v1223_v29 = vmul.f32 0.0078125, %v1133_v44 }
 0x2a9   : > { %1581 = vst [vmem:[%s3533_s18 + $0x8] sm:$0xff] %v1517_v26  ;;  %v1480_v39 = vmul.f32 %v3522_v12, %v1411_v11  ;;  %2026 = vrsqrt.f32 %v1286_v13  ;;  %v1196_v15 = vmul.f32 0.0078125, %v1079_v32  ;;  %v4009_v32 = vld [vmem:[#allocation16_spill] sm:$0xff] }
 0x2aa   : > { %v2017_v53 = vpop.eup %2016  ;;  %1612 = vst [vmem:[%s3533_s18 + $0x100] sm:$0xff] %v1548_v36  ;;  %v1453_v58 = vmul.f32 %v3522_v12, %v1384_v37  ;;  %v1287_v18 = vadd.f32 1e-05, %v1223_v29 }
 0x2ab   : > { %v2019_v5 = vpop.eup %2018  ;;  %v1549_v17 = vadd.f32 %v3525_v4, %v1480_v39  ;;  %v1385_v9 = vmul.f32 %v2017_v53, %v3244_v41  ;;  %v1260_v8 = vadd.f32 1e-05, %v1196_v15  ;;  %v1081_v7 = vpop.xlane.xlu1 %1080  ;;  %v4010_v53 = vld [vmem:[#allocation19_spill] sm:$0xff] }
 0x2ac   : > { %v1143_v24 = vpop.xlane.xlu0 %1142  ;;  %v1522_v10 = vadd.f32 %v3525_v4, %v1453_v58  ;;  %v1416_v43 = vmul.f32 %v2019_v5, %v4008_v56  ;;  %2028 = vrsqrt.f32 %v1287_v18  ;;  %v1197_v48 = vmul.f32 0.0078125, %v1081_v7  ;;  %v4011_v56 = vld [vmem:[#allocation18_spill] sm:$0xff] }
 0x2ad   : > { %1613 = vst [vmem:[%s3533_s18 + $0x108] sm:$0xff] %v1549_v17  ;;  %v1454_v61 = vmul.f32 %v3522_v12, %v1385_v9  ;;  %2030 = vrsqrt.f32 %v1260_v8  ;;  %v1228_v14 = vmul.f32 0.0078125, %v1143_v24 }
 0x2ae   : > { %v2021_v26 = vpop.eup %2020  ;;  %1586 = vst [vmem:[%s3533_s18 + $0x30] sm:$0xff] %v1522_v10  ;;  %v1485_v11 = vmul.f32 %v3522_v12, %v1416_v43  ;;  %v1261_v41 = vadd.f32 1e-05, %v1197_v48 }
 0x2af   : > { %v2023_v13 = vpop.eup %2022  ;;  %v1523_v44 = vadd.f32 %v3525_v4, %v1454_v61  ;;  %v1417_v36 = vmul.f32 %v2021_v26, %v4009_v32  ;;  %v1292_v37 = vadd.f32 1e-05, %v1228_v14  ;;  %v1145_v29 = vpop.xlane.xlu1 %1144 }
 0x2b0   : > { %v1075_v39 = vpop.xlane.xlu0 %1074  ;;  %v1554_v15 = vadd.f32 %v3525_v4, %v1485_v11  ;;  %v1382_v58 = vmul.f32 %v2023_v13, %v4010_v53  ;;  %2032 = vrsqrt.f32 %v1261_v41  ;;  %v1229_v18 = vmul.f32 0.0078125, %v1145_v29  ;;  %v4012_v11 = vld [vmem:[#allocation13_spill] sm:$0xff]  ;;  %v4013_v53 = vld [vmem:[#allocation12_spill] sm:$0xff] }
 0x2b1   : > { %1587 = vst [vmem:[%s3533_s18 + $0x38] sm:$0xff] %v1523_v44  ;;  %v1486_v5 = vmul.f32 %v3522_v12, %v1417_v36  ;;  %2034 = vrsqrt.f32 %v1292_v37  ;;  %v1194_v17 = vmul.f32 0.0078125, %v1075_v39 }
 0x2b2   : > { %v2025_v9 = vpop.eup %2024  ;;  %1618 = vst [vmem:[%s3533_s18 + $0x130] sm:$0xff] %v1554_v15  ;;  %v1451_v8 = vmul.f32 %v3522_v12, %v1382_v58  ;;  %v1293_v7 = vadd.f32 1e-05, %v1229_v18 }
 0x2b3   : > { %v2027_v24 = vpop.eup %2026  ;;  %v1555_v10 = vadd.f32 %v3525_v4, %v1486_v5  ;;  %v1383_v43 = vmul.f32 %v2025_v9, %v4011_v56  ;;  %v1258_v48 = vadd.f32 1e-05, %v1194_v17  ;;  %v1077_v61 = vpop.xlane.xlu1 %1076 }
 0x2b4   : > { %v1139_v14 = vpop.xlane.xlu0 %1138  ;;  %v1520_v26 = vadd.f32 %v3525_v4, %v1451_v8  ;;  %v1414_v41 = vmul.f32 %v2027_v24, %v4012_v11  ;;  %2036 = vrsqrt.f32 %v1293_v7  ;;  %v1195_v13 = vmul.f32 0.0078125, %v1077_v61  ;;  %v4014_v8 = vld [vmem:[#allocation15_spill] sm:$0xff]  ;;  %v4015_v11 = vld [vmem:[#allocation14_spill] sm:$0xff] }
 0x2b5   : > { %1619 = vst [vmem:[%s3533_s18 + $0x138] sm:$0xff] %v1555_v10  ;;  %v1452_v44 = vmul.f32 %v3522_v12, %v1383_v43  ;;  %2038 = vrsqrt.f32 %v1258_v48  ;;  %v1226_v32 = vmul.f32 0.0078125, %v1139_v14 }
 0x2b6   : > { %v2029_v36 = vpop.eup %2028  ;;  %1584 = vst [vmem:[%s3533_s18 + $0x20] sm:$0xff] %v1520_v26  ;;  %v1483_v37 = vmul.f32 %v3522_v12, %v1414_v41  ;;  %v1259_v29 = vadd.f32 1e-05, %v1195_v13 }
 0x2b7   : > { %v2031_v39 = vpop.eup %2030  ;;  %v1521_v15 = vadd.f32 %v3525_v4, %v1452_v44  ;;  %v1415_v58 = vmul.f32 %v2029_v36, %v4013_v53  ;;  %v1290_v18 = vadd.f32 1e-05, %v1226_v32  ;;  %v1141_v5 = vpop.xlane.xlu1 %1140 }
 0x2b8   : > { %v1087_v17 = vpop.xlane.xlu0 %1086  ;;  %v1552_v9 = vadd.f32 %v3525_v4, %v1483_v37  ;;  %v1388_v7 = vmul.f32 %v2031_v39, %v4014_v8  ;;  %2040 = vrsqrt.f32 %v1259_v29  ;;  %v1227_v24 = vmul.f32 0.0078125, %v1141_v5  ;;  %v4016_v37 = vld [vmem:[#allocation25_spill] sm:$0xff]  ;;  %v4017_v8 = vld [vmem:[#allocation24_spill] sm:$0xff] }
 0x2b9   : > { %1585 = vst [vmem:[%s3533_s18 + $0x28] sm:$0xff] %v1521_v15  ;;  %v1484_v10 = vmul.f32 %v3522_v12, %v1415_v58  ;;  %2042 = vrsqrt.f32 %v1290_v18  ;;  %v1200_v56 = vmul.f32 0.0078125, %v1087_v17 }
 0x2ba   : > { %v2033_v43 = vpop.eup %2032  ;;  %1616 = vst [vmem:[%s3533_s18 + $0x120] sm:$0xff] %v1552_v9  ;;  %v1457_v48 = vmul.f32 %v3522_v12, %v1388_v7  ;;  %v1291_v61 = vadd.f32 1e-05, %v1227_v24 }
 0x2bb   : > { %v2035_v14 = vpop.eup %2034  ;;  %v1553_v26 = vadd.f32 %v3525_v4, %v1484_v10  ;;  %v1389_v41 = vmul.f32 %v2033_v43, %v4015_v11  ;;  %v1264_v13 = vadd.f32 1e-05, %v1200_v56  ;;  %v1089_v44 = vpop.xlane.xlu1 %1088 }
 0x2bc   : > { %v1151_v32 = vpop.xlane.xlu0 %1150  ;;  %v1526_v36 = vadd.f32 %v3525_v4, %v1457_v48  ;;  %v1420_v29 = vmul.f32 %v2035_v14, %v4016_v37  ;;  %2044 = vrsqrt.f32 %v1291_v61  ;;  %v1201_v39 = vmul.f32 0.0078125, %v1089_v44  ;;  %v4018_v48 = vld [vmem:[#allocation27_spill] sm:$0xff]  ;;  %v4019_v37 = vld [vmem:[#allocation26_spill] sm:$0xff] }
 0x2bd   : > { %1617 = vst [vmem:[%s3533_s18 + $0x128] sm:$0xff] %v1553_v26  ;;  %v1458_v15 = vmul.f32 %v3522_v12, %v1389_v41  ;;  %2046 = vrsqrt.f32 %v1264_v13  ;;  %v1232_v53 = vmul.f32 0.0078125, %v1151_v32 }
 0x2be   : > { %v2037_v58 = vpop.eup %2036  ;;  %1590 = vst [vmem:[%s3533_s18 + $0x50] sm:$0xff] %v1526_v36  ;;  %v1489_v18 = vmul.f32 %v3522_v12, %v1420_v29  ;;  %v1265_v5 = vadd.f32 1e-05, %v1201_v39 }
 0x2bf   : > { %v2039_v17 = vpop.eup %2038  ;;  %v1527_v9 = vadd.f32 %v3525_v4, %v1458_v15  ;;  %v1421_v7 = vmul.f32 %v2037_v58, %v4017_v8  ;;  %v1296_v24 = vadd.f32 1e-05, %v1232_v53  ;;  %v1153_v10 = vpop.xlane.xlu1 %1152 }
 0x2c0   : > { %v1083_v56 = vpop.xlane.xlu0 %1082  ;;  %v1558_v43 = vadd.f32 %v3525_v4, %v1489_v18  ;;  %v1386_v61 = vmul.f32 %v2039_v17, %v4018_v48  ;;  %2048 = vrsqrt.f32 %v1265_v5  ;;  %v1233_v14 = vmul.f32 0.0078125, %v1153_v10 }
 0x2c1   : > { %1591 = vst [vmem:[%s3533_s18 + $0x58] sm:$0xff] %v1527_v9  ;;  %v1490_v26 = vmul.f32 %v3522_v12, %v1421_v7  ;;  %2050 = vrsqrt.f32 %v1296_v24  ;;  %v1198_v11 = vmul.f32 0.0078125, %v1083_v56 }
 0x2c2   : > { %v2041_v41 = vpop.eup %2040  ;;  %1622 = vst [vmem:[%s3533_s18 + $0x150] sm:$0xff] %v1558_v43  ;;  %v1455_v13 = vmul.f32 %v3522_v12, %v1386_v61  ;;  %v1297_v44 = vadd.f32 1e-05, %v1233_v14 }
 0x2c3   : > { %v2043_v32 = vpop.eup %2042  ;;  %v1559_v36 = vadd.f32 %v3525_v4, %v1490_v26  ;;  %v1387_v29 = vmul.f32 %v2041_v41, %v4019_v37  ;;  %v1262_v39 = vadd.f32 1e-05, %v1198_v11  ;;  %v1085_v15 = vpop.xlane.xlu1 %1084  ;;  %v4020_v26 = vld [vmem:[#allocation21_spill] sm:$0xff] }
 0x2c4   : > { %v1147_v53 = vpop.xlane.xlu0 %1146  ;;  %v1524_v58 = vadd.f32 %v3525_v4, %v1455_v13  ;;  %v1418_v18 = vmul.f32 %v2043_v32, %v3311_v38  ;;  %2052 = vrsqrt.f32 %v1297_v44  ;;  %v1199_v5 = vmul.f32 0.0078125, %v1085_v15 }
 0x2c5   : > { %1623 = vst [vmem:[%s3533_s18 + $0x158] sm:$0xff] %v1559_v36  ;;  %v1456_v17 = vmul.f32 %v3522_v12, %v1387_v29  ;;  %2054 = vrsqrt.f32 %v1262_v39  ;;  %v1230_v9 = vmul.f32 0.0078125, %v1147_v53  ;;  %v4021_v39 = vld [vmem:[#allocation20_spill] sm:$0xff] }
 0x2c6   : > { %v2045_v8 = vpop.eup %2044  ;;  %1588 = vst [vmem:[%s3533_s18 + $0x40] sm:$0xff] %v1524_v58  ;;  %v1487_v7 = vmul.f32 %v3522_v12, %v1418_v18  ;;  %v1263_v24 = vadd.f32 1e-05, %v1199_v5 }
 0x2c7   : > { %v2047_v10 = vpop.eup %2046  ;;  %v1525_v56 = vadd.f32 %v3525_v4, %v1456_v17  ;;  %v1419_v43 = vmul.f32 %v2045_v8, %v3318_v52  ;;  %v1294_v38 = vadd.f32 1e-05, %v1230_v9  ;;  %v1149_v48 = vpop.xlane.xlu1 %1148 }
 0x2c8   : > { %v1095_v61 = vpop.xlane.xlu0 %1094  ;;  %v1556_v14 = vadd.f32 %v3525_v4, %v1487_v7  ;;  %v1392_v11 = vmul.f32 %v2047_v10, %v4020_v26  ;;  %2056 = vrsqrt.f32 %v1263_v24  ;;  %v1231_v41 = vmul.f32 0.0078125, %v1149_v48 }
 0x2c9   : > { %1589 = vst [vmem:[%s3533_s18 + $0x48] sm:$0xff] %v1525_v56  ;;  %v1488_v13 = vmul.f32 %v3522_v12, %v1419_v43  ;;  %2058 = vrsqrt.f32 %v1294_v38  ;;  %v1204_v44 = vmul.f32 0.0078125, %v1095_v61 }
 0x2ca   : > { %v2049_v32 = vpop.eup %2048  ;;  %1620 = vst [vmem:[%s3533_s18 + $0x140] sm:$0xff] %v1556_v14  ;;  %v1461_v36 = vmul.f32 %v3522_v12, %v1392_v11  ;;  %v1295_v52 = vadd.f32 1e-05, %v1231_v41 }
 0x2cb   : > { %v2051_v37 = vpop.eup %2050  ;;  %v1557_v29 = vadd.f32 %v3525_v4, %v1488_v13  ;;  %v1393_v15 = vmul.f32 %v2049_v32, %v4021_v39  ;;  %v1268_v53 = vadd.f32 1e-05, %v1204_v44  ;;  %v1097_v58 = vpop.xlane.xlu1 %1096 }
 0x2cc   : > { %v1159_v18 = vpop.xlane.xlu0 %1158  ;;  %v1530_v5 = vadd.f32 %v3525_v4, %v1461_v36  ;;  %v1424_v17 = vmul.f32 %v2051_v37, %v3331_v16  ;;  %2060 = vrsqrt.f32 %v1295_v52  ;;  %v1205_v9 = vmul.f32 0.0078125, %v1097_v58 }
 0x2cd   : > { %1621 = vst [vmem:[%s3533_s18 + $0x148] sm:$0xff] %v1557_v29  ;;  %v1462_v8 = vmul.f32 %v3522_v12, %v1393_v15  ;;  %2062 = vrsqrt.f32 %v1268_v53  ;;  %v1236_v7 = vmul.f32 0.0078125, %v1159_v18 }
 0x2ce   : > { %v2053_v24 = vpop.eup %2052  ;;  %1594 = vst [vmem:[%s3533_s18 + $0x70] sm:$0xff] %v1530_v5  ;;  %v1493_v10 = vmul.f32 %v3522_v12, %v1424_v17  ;;  %v1269_v56 = vadd.f32 1e-05, %v1205_v9 }
 0x2cf   : > { %v2055_v43 = vpop.eup %2054  ;;  %v1531_v38 = vadd.f32 %v3525_v4, %v1462_v8  ;;  %v1425_v48 = vmul.f32 %v2053_v24, %v3338_v33  ;;  %v1300_v16 = vadd.f32 1e-05, %v1236_v7  ;;  %v1161_v61 = vpop.xlane.xlu1 %1160 }
 0x2d0   : > { %v1091_v14 = vpop.xlane.xlu0 %1090  ;;  %v1562_v26 = vadd.f32 %v3525_v4, %v1493_v10  ;;  %v1390_v11 = vmul.f32 %v2055_v43, %v3341_v3  ;;  %2064 = vrsqrt.f32 %v1269_v56  ;;  %v1237_v41 = vmul.f32 0.0078125, %v1161_v61 }
 0x2d1   : > { %1595 = vst [vmem:[%s3533_s18 + $0x78] sm:$0xff] %v1531_v38  ;;  %v1494_v13 = vmul.f32 %v3522_v12, %v1425_v48  ;;  %2066 = vrsqrt.f32 %v1300_v16  ;;  %v1202_v44 = vmul.f32 0.0078125, %v1091_v14 }
 0x2d2   : > { %v2057_v32 = vpop.eup %2056  ;;  %1626 = vst [vmem:[%s3533_s18 + $0x170] sm:$0xff] %v1562_v26  ;;  %v1459_v36 = vmul.f32 %v3522_v12, %v1390_v11  ;;  %v1301_v33 = vadd.f32 1e-05, %v1237_v41 }
 0x2d3   : > { %v2059_v52 = vpop.eup %2058  ;;  %v1563_v37 = vadd.f32 %v3525_v4, %v1494_v13  ;;  %v1391_v29 = vmul.f32 %v2057_v32, %v3344_v35  ;;  %v1266_v3 = vadd.f32 1e-05, %v1202_v44  ;;  %v1093_v39 = vpop.xlane.xlu1 %1092 }
 0x2d4   : > { %v1155_v15 = vpop.xlane.xlu0 %1154  ;;  %v1528_v53 = vadd.f32 %v3525_v4, %v1459_v36  ;;  %v1422_v58 = vmul.f32 %v2059_v52, %v3351_v59  ;;  %2068 = vrsqrt.f32 %v1301_v33  ;;  %v1203_v18 = vmul.f32 0.0078125, %v1093_v39 }
 0x2d5   : > { %1627 = vst [vmem:[%s3533_s18 + $0x178] sm:$0xff] %v1563_v37  ;;  %v1460_v5 = vmul.f32 %v3522_v12, %v1391_v29  ;;  %2070 = vrsqrt.f32 %v1266_v3  ;;  %v1234_v17 = vmul.f32 0.0078125, %v1155_v15 }
 0x2d6   : > { %v2061_v9 = vpop.eup %2060  ;;  %1592 = vst [vmem:[%s3533_s18 + $0x60] sm:$0xff] %v1528_v53  ;;  %v1491_v8 = vmul.f32 %v3522_v12, %v1422_v58  ;;  %v1267_v35 = vadd.f32 1e-05, %v1203_v18 }
 0x2d7   : > { %v2063_v7 = vpop.eup %2062  ;;  %v1529_v24 = vadd.f32 %v3525_v4, %v1460_v5  ;;  %v1423_v10 = vmul.f32 %v2061_v9, %v3356_v31  ;;  %v1298_v59 = vadd.f32 1e-05, %v1234_v17  ;;  %v1157_v56 = vpop.xlane.xlu1 %1156 }
 0x2d8   : > { %v1103_v43 = vpop.xlane.xlu0 %1102  ;;  %v1560_v38 = vadd.f32 %v3525_v4, %v1491_v8  ;;  %v1396_v48 = vmul.f32 %v2063_v7, %v3361_v51  ;;  %2072 = vrsqrt.f32 %v1267_v35  ;;  %v1235_v16 = vmul.f32 0.0078125, %v1157_v56 }
 0x2d9   : > { %1593 = vst [vmem:[%s3533_s18 + $0x68] sm:$0xff] %v1529_v24  ;;  %v1492_v61 = vmul.f32 %v3522_v12, %v1423_v10  ;;  %2074 = vrsqrt.f32 %v1298_v59  ;;  %v1208_v14 = vmul.f32 0.0078125, %v1103_v43 }
 0x2da   : > { %v2065_v26 = vpop.eup %2064  ;;  %1624 = vst [vmem:[%s3533_s18 + $0x160] sm:$0xff] %v1560_v38  ;;  %v1465_v11 = vmul.f32 %v3522_v12, %v1396_v48  ;;  %v1299_v31 = vadd.f32 1e-05, %v1235_v16 }
 0x2db   : > { %v2067_v41 = vpop.eup %2066  ;;  %v1561_v13 = vadd.f32 %v3525_v4, %v1492_v61  ;;  %v1397_v44 = vmul.f32 %v2065_v26, %v3364_v42  ;;  %v1272_v51 = vadd.f32 1e-05, %v1208_v14  ;;  %v1105_v32 = vpop.xlane.xlu1 %1104 }
 0x2dc   : > { %v1167_v36 = vpop.xlane.xlu0 %1166  ;;  %v1534_v33 = vadd.f32 %v3525_v4, %v1465_v11  ;;  %v1428_v52 = vmul.f32 %v2067_v41, %v3371_v28  ;;  %2076 = vrsqrt.f32 %v1299_v31  ;;  %v1209_v37 = vmul.f32 0.0078125, %v1105_v32 }
 0x2dd   : > { %1625 = vst [vmem:[%s3533_s18 + $0x168] sm:$0xff] %v1561_v13  ;;  %v1466_v29 = vmul.f32 %v3522_v12, %v1397_v44  ;;  %2078 = vrsqrt.f32 %v1272_v51  ;;  %v1240_v3 = vmul.f32 0.0078125, %v1167_v36 }
 0x2de   : > { %v2069_v39 = vpop.eup %2068  ;;  %1598 = vst [vmem:[%s3533_s18 + $0x90] sm:$0xff] %v1534_v33  ;;  %v1497_v15 = vmul.f32 %v3522_v12, %v1428_v52  ;;  %v1273_v42 = vadd.f32 1e-05, %v1209_v37 }
 0x2df   : > { %v2071_v53 = vpop.eup %2070  ;;  %v1535_v58 = vadd.f32 %v3525_v4, %v1466_v29  ;;  %v1429_v18 = vmul.f32 %v2069_v39, %v3376_v27  ;;  %v1304_v28 = vadd.f32 1e-05, %v1240_v3  ;;  %v1169_v5 = vpop.xlane.xlu1 %1168 }
 0x2e0   : > { %v1099_v17 = vpop.xlane.xlu0 %1098  ;;  %v1566_v9 = vadd.f32 %v3525_v4, %v1497_v15  ;;  %v1394_v8 = vmul.f32 %v2071_v53, %v3381_v19  ;;  %2080 = vrsqrt.f32 %v1273_v42  ;;  %v1241_v35 = vmul.f32 0.0078125, %v1169_v5 }
 0x2e1   : > { %1599 = vst [vmem:[%s3533_s18 + $0x98] sm:$0xff] %v1535_v58  ;;  %v1498_v7 = vmul.f32 %v3522_v12, %v1429_v18  ;;  %2082 = vrsqrt.f32 %v1304_v28  ;;  %v1206_v24 = vmul.f32 0.0078125, %v1099_v17 }
 0x2e2   : > { %v2073_v10 = vpop.eup %2072  ;;  %1630 = vst [vmem:[%s3533_s18 + $0x190] sm:$0xff] %v1566_v9  ;;  %v1463_v59 = vmul.f32 %v3522_v12, %v1394_v8  ;;  %v1305_v27 = vadd.f32 1e-05, %v1241_v35 }
 0x2e3   : > { %v2075_v56 = vpop.eup %2074  ;;  %v1567_v43 = vadd.f32 %v3525_v4, %v1498_v7  ;;  %v1395_v38 = vmul.f32 %v2073_v10, %v3384_v45  ;;  %v1270_v19 = vadd.f32 1e-05, %v1206_v24  ;;  %v1101_v48 = vpop.xlane.xlu1 %1100 }
 0x2e4   : > { %v1163_v16 = vpop.xlane.xlu0 %1162  ;;  %v1532_v61 = vadd.f32 %v3525_v4, %v1463_v59  ;;  %v1426_v14 = vmul.f32 %v2075_v56, %v3391_v46  ;;  %2084 = vrsqrt.f32 %v1305_v27  ;;  %v1207_v26 = vmul.f32 0.0078125, %v1101_v48 }
 0x2e5   : > { %1631 = vst [vmem:[%s3533_s18 + $0x198] sm:$0xff] %v1567_v43  ;;  %v1464_v11 = vmul.f32 %v3522_v12, %v1395_v38  ;;  %2086 = vrsqrt.f32 %v1270_v19  ;;  %v1238_v31 = vmul.f32 0.0078125, %v1163_v16 }
 0x2e6   : > { %v2077_v41 = vpop.eup %2076  ;;  %1596 = vst [vmem:[%s3533_s18 + $0x80] sm:$0xff] %v1532_v61  ;;  %v1495_v13 = vmul.f32 %v3522_v12, %v1426_v14  ;;  %v1271_v45 = vadd.f32 1e-05, %v1207_v26 }
 0x2e7   : > { %v2079_v44 = vpop.eup %2078  ;;  %v1533_v51 = vadd.f32 %v3525_v4, %v1464_v11  ;;  %v1427_v32 = vmul.f32 %v2077_v41, %v3396_v50  ;;  %v1302_v46 = vadd.f32 1e-05, %v1238_v31  ;;  %v1165_v36 = vpop.xlane.xlu1 %1164 }
 0x2e8   : > { %v1111_v33 = vpop.xlane.xlu0 %1110  ;;  %v1564_v52 = vadd.f32 %v3525_v4, %v1495_v13  ;;  %v1400_v37 = vmul.f32 %v2079_v44, %v3401_v40  ;;  %2088 = vrsqrt.f32 %v1271_v45  ;;  %v1239_v29 = vmul.f32 0.0078125, %v1165_v36 }
 0x2e9   : > { %1597 = vst [vmem:[%s3533_s18 + $0x88] sm:$0xff] %v1533_v51  ;;  %v1496_v3 = vmul.f32 %v3522_v12, %v1427_v32  ;;  %2090 = vrsqrt.f32 %v1302_v46  ;;  %v1212_v39 = vmul.f32 0.0078125, %v1111_v33 }
 0x2ea   : > { %v2081_v15 = vpop.eup %2080  ;;  %1628 = vst [vmem:[%s3533_s18 + $0x180] sm:$0xff] %v1564_v52  ;;  %v1469_v42 = vmul.f32 %v3522_v12, %v1400_v37  ;;  %v1303_v50 = vadd.f32 1e-05, %v1239_v29 }
 0x2eb   : > { %v2083_v53 = vpop.eup %2082  ;;  %v1565_v58 = vadd.f32 %v3525_v4, %v1496_v3  ;;  %v1401_v18 = vmul.f32 %v2081_v15, %v3404_v1  ;;  %v1276_v40 = vadd.f32 1e-05, %v1212_v39  ;;  %v1113_v28 = vpop.xlane.xlu1 %1112 }
 0x2ec   : > { %v1175_v5 = vpop.xlane.xlu0 %1174  ;;  %v1538_v17 = vadd.f32 %v3525_v4, %v1469_v42  ;;  %v1432_v9 = vmul.f32 %v2083_v53, %v3411_v63  ;;  %2092 = vrsqrt.f32 %v1303_v50  ;;  %v1213_v8 = vmul.f32 0.0078125, %v1113_v28 }
 0x2ed   : > { %1629 = vst [vmem:[%s3533_s18 + $0x188] sm:$0xff] %v1565_v58  ;;  %v1470_v35 = vmul.f32 %v3522_v12, %v1401_v18  ;;  %2094 = vrsqrt.f32 %v1276_v40  ;;  %v1244_v7 = vmul.f32 0.0078125, %v1175_v5 }
 0x2ee   : > { %v2085_v24 = vpop.eup %2084  ;;  %1602 = vst [vmem:[%s3533_s18 + $0xb0] sm:$0xff] %v1538_v17  ;;  %v1501_v10 = vmul.f32 %v3522_v12, %v1432_v9  ;;  %v1277_v1 = vadd.f32 1e-05, %v1213_v8 }
 0x2ef   : > { %v2087_v59 = vpop.eup %2086  ;;  %v1539_v27 = vadd.f32 %v3525_v4, %v1470_v35  ;;  %v1433_v56 = vmul.f32 %v2085_v24, %v3416_v62  ;;  %v1308_v63 = vadd.f32 1e-05, %v1244_v7  ;;  %v1177_v43 = vpop.xlane.xlu1 %1176 }
 0x2f0   : > { %v1107_v38 = vpop.xlane.xlu0 %1106  ;;  %v1570_v19 = vadd.f32 %v3525_v4, %v1501_v10  ;;  %v1398_v48 = vmul.f32 %v2087_v59, %v3421_v30  ;;  %2096 = vrsqrt.f32 %v1277_v1  ;;  %v1245_v16 = vmul.f32 0.0078125, %v1177_v43 }
 0x2f1   : > { %1603 = vst [vmem:[%s3533_s18 + $0xb8] sm:$0xff] %v1539_v27  ;;  %v1502_v61 = vmul.f32 %v3522_v12, %v1433_v56  ;;  %2098 = vrsqrt.f32 %v1308_v63  ;;  %v1210_v14 = vmul.f32 0.0078125, %v1107_v38 }
 0x2f2   : > { %v2089_v26 = vpop.eup %2088  ;;  %1634 = vst [vmem:[%s3533_s18 + $0x1b0] sm:$0xff] %v1570_v19  ;;  %v1467_v11 = vmul.f32 %v3522_v12, %v1398_v48  ;;  %v1309_v62 = vadd.f32 1e-05, %v1245_v16 }
 0x2f3   : > { %v2091_v31 = vpop.eup %2090  ;;  %v1571_v41 = vadd.f32 %v3525_v4, %v1502_v61  ;;  %v1399_v13 = vmul.f32 %v2089_v26, %v3424_v57  ;;  %v1274_v30 = vadd.f32 1e-05, %v1210_v14  ;;  %v1109_v45 = vpop.xlane.xlu1 %1108 }
 0x2f4   : > { %v1171_v44 = vpop.xlane.xlu0 %1170  ;;  %v1536_v51 = vadd.f32 %v3525_v4, %v1467_v11  ;;  %v1430_v32 = vmul.f32 %v2091_v31, %v3431_v55  ;;  %2100 = vrsqrt.f32 %v1309_v62  ;;  %v1211_v46 = vmul.f32 0.0078125, %v1109_v45 }
 0x2f5   : > { %1635 = vst [vmem:[%s3533_s18 + $0x1b8] sm:$0xff] %v1571_v41  ;;  %v1468_v36 = vmul.f32 %v3522_v12, %v1399_v13  ;;  %2102 = vrsqrt.f32 %v1274_v30  ;;  %v1242_v33 = vmul.f32 0.0078125, %v1171_v44 }
 0x2f6   : > { %v2093_v52 = vpop.eup %2092  ;;  %1600 = vst [vmem:[%s3533_s18 + $0xa0] sm:$0xff] %v1536_v51  ;;  %v1499_v37 = vmul.f32 %v3522_v12, %v1430_v32  ;;  %v1275_v57 = vadd.f32 1e-05, %v1211_v46 }
 0x2f7   : > { %v2095_v29 = vpop.eup %2094  ;;  %v1537_v3 = vadd.f32 %v3525_v4, %v1468_v36  ;;  %v1431_v39 = vmul.f32 %v2093_v52, %v3436_v54  ;;  %v1306_v55 = vadd.f32 1e-05, %v1242_v33  ;;  %v1173_v15 = vpop.xlane.xlu1 %1172 }
 0x2f8   : > { %v1119_v42 = vpop.xlane.xlu0 %1118  ;;  %v1568_v50 = vadd.f32 %v3525_v4, %v1499_v37  ;;  %v1404_v53 = vmul.f32 %v2095_v29, %v3441_v21  ;;  %2104 = vrsqrt.f32 %v1275_v57  ;;  %v1243_v58 = vmul.f32 0.0078125, %v1173_v15 }
 0x2f9   : > { %1601 = vst [vmem:[%s3533_s18 + $0xa8] sm:$0xff] %v1537_v3  ;;  %v1500_v18 = vmul.f32 %v3522_v12, %v1431_v39  ;;  %2106 = vrsqrt.f32 %v1306_v55  ;;  %v1216_v40 = vmul.f32 0.0078125, %v1119_v42  ;;  %v4022_v55 = vld [vmem:[#allocation23_spill] sm:$0xff] }
 0x2fa   : > { %v2097_v28 = vpop.eup %2096  ;;  %1632 = vst [vmem:[%s3533_s18 + $0x1a0] sm:$0xff] %v1568_v50  ;;  %v1473_v54 = vmul.f32 %v3522_v12, %v1404_v53  ;;  %v1307_v5 = vadd.f32 1e-05, %v1243_v58 }
 0x2fb   : > { %v2099_v17 = vpop.eup %2098  ;;  %v1569_v9 = vadd.f32 %v3525_v4, %v1500_v18  ;;  %v1405_v8 = vmul.f32 %v2097_v28, %v3444_v25  ;;  %v1280_v21 = vadd.f32 1e-05, %v1216_v40  ;;  %v1121_v35 = vpop.xlane.xlu1 %1120  ;;  %v4023_v28 = vld [vmem:[#allocation22_spill] sm:$0xff] }
 0x2fc   : > { %v1542_v7 = vadd.f32 %v3525_v4, %v1473_v54  ;;  %v1436_v24 = vmul.f32 %v2099_v17, %v3451_v23  ;;  %2108 = vrsqrt.f32 %v1307_v5  ;;  %v1217_v10 = vmul.f32 0.0078125, %v1121_v35 }
 0x2fd   : > { %1633 = vst [vmem:[%s3533_s18 + $0x1a8] sm:$0xff] %v1569_v9  ;;  %v1474_v1 = vmul.f32 %v3522_v12, %v1405_v8  ;;  %2110 = vrsqrt.f32 %v1280_v21  ;;  %v2126_v9 = vld [vmem:[#allocation7 + $0x1] ss:$0 sm:$0xff] }
 0x2fe   : > { %v2101_v59 = vpop.eup %2100  ;;  %1606 = vst [vmem:[%s3533_s18 + $0xd0] sm:$0xff] %v1542_v7  ;;  %v1505_v27 = vmul.f32 %v3522_v12, %v1436_v24  ;;  %v1281_v56 = vadd.f32 1e-05, %v1217_v10  ;;  %v2127_v7 = vld [vmem:[#allocation7 + $0x2] ss:$0 sm:$0xff] }
 0x2ff   : > { %v2103_v25 = vpop.eup %2102  ;;  %v1543_v63 = vadd.f32 %v3525_v4, %v1474_v1  ;;  %v1437_v43 = vmul.f32 %v2101_v59, %v3456_v22  ;;  %v1117_v38 = vpop.xlane.xlu1 %1116 }
 0x300   : > { %v1115_v23 = vpop.xlane.xlu0 %1114  ;;  %v1574_v19 = vadd.f32 %v3525_v4, %v1505_v27  ;;  %v1402_v48 = vmul.f32 %v2103_v25, %v3461_v47  ;;  %2112 = vrsqrt.f32 %v1281_v56  ;;  %v1215_v16 = vmul.f32 0.0078125, %v1117_v38 }
 0x301   : > { %1607 = vst [vmem:[%s3533_s18 + $0xd8] sm:$0xff] %v1543_v63  ;;  %v1506_v61 = vmul.f32 %v3522_v12, %v1437_v43  ;;  %v1214_v14 = vmul.f32 0.0078125, %v1115_v23 }
 0x302   : > { %v2105_v26 = vpop.eup %2104  ;;  %1638 = vst [vmem:[%s3533_s18 + $0x1d0] sm:$0xff] %v1574_v19  ;;  %v1471_v11 = vmul.f32 %v3522_v12, %v1402_v48  ;;  %v1279_v62 = vadd.f32 1e-05, %v1215_v16  ;;  %v4024_v48 = vld [vmem:[#allocation29_spill] sm:$0xff] }
 0x303   : > { %v2107_v22 = vpop.eup %2106  ;;  %v1575_v31 = vadd.f32 %v3525_v4, %v1506_v61  ;;  %v1403_v41 = vmul.f32 %v2105_v26, %v3464_v34  ;;  %v1278_v13 = vadd.f32 1e-05, %v1214_v14  ;;  %v1181_v47 = vpop.xlane.xlu1 %1180  ;;  %v4025_v14 = vld [vmem:[#allocation28_spill] sm:$0xff] }
 0x304   : > { %v1179_v30 = vpop.xlane.xlu0 %1178  ;;  %v1540_v45 = vadd.f32 %v3525_v4, %v1471_v11  ;;  %v1434_v44 = vmul.f32 %v2107_v22, %v3471_v49  ;;  %2114 = vrsqrt.f32 %v1279_v62  ;;  %v1247_v51 = vmul.f32 0.0078125, %v1181_v47 }
 0x305   : > { %1639 = vst [vmem:[%s3533_s18 + $0x1d8] sm:$0xff] %v1575_v31  ;;  %v1472_v32 = vmul.f32 %v3522_v12, %v1403_v41  ;;  %2116 = vrsqrt.f32 %v1278_v13  ;;  %v1246_v46 = vmul.f32 0.0078125, %v1179_v30 }
 0x306   : > { %v2109_v36 = vpop.eup %2108  ;;  %1604 = vst [vmem:[%s3533_s18 + $0xc0] sm:$0xff] %v1540_v45  ;;  %v1503_v33 = vmul.f32 %v3522_v12, %v1434_v44  ;;  %v1311_v34 = vadd.f32 1e-05, %v1247_v51 }
 0x307   : > { %v2111_v52 = vpop.eup %2110  ;;  %v1541_v37 = vadd.f32 %v3525_v4, %v1472_v32  ;;  %v1435_v57 = vmul.f32 %v2109_v36, %v3476_v2  ;;  %v1310_v49 = vadd.f32 1e-05, %v1246_v46  ;;  %v1185_v29 = vpop.xlane.xlu1 %1184 }
 0x308   : > { %v1183_v3 = vpop.xlane.xlu0 %1182  ;;  %v1572_v39 = vadd.f32 %v3525_v4, %v1503_v33  ;;  %v1408_v15 = vmul.f32 %v2111_v52, %v4022_v55  ;;  %2118 = vrsqrt.f32 %v1311_v34  ;;  %v1249_v42 = vmul.f32 0.0078125, %v1185_v29 }
 0x309   : > { %1605 = vst [vmem:[%s3533_s18 + $0xc8] sm:$0xff] %v1541_v37  ;;  %v1504_v50 = vmul.f32 %v3522_v12, %v1435_v57  ;;  %2120 = vrsqrt.f32 %v1310_v49  ;;  %v1248_v53 = vmul.f32 0.0078125, %v1183_v3 }
 0x30a   : > { %v2113_v58 = vpop.eup %2112  ;;  %1636 = vst [vmem:[%s3533_s18 + $0x1c0] sm:$0xff] %v1572_v39  ;;  %v1477_v2 = vmul.f32 %v3522_v12, %v1408_v15  ;;  %v1313_v18 = vadd.f32 1e-05, %v1249_v42 }
 0x30b   : > { %v1573_v40 = vadd.f32 %v3525_v4, %v1504_v50  ;;  %v1409_v54 = vmul.f32 %v2113_v58, %v4023_v28  ;;  %v1312_v5 = vadd.f32 1e-05, %v1248_v53 }
 0x30c   : > { %v1546_v17 = vadd.f32 %v3525_v4, %v1477_v2  ;;  %2122 = vrsqrt.f32 %v1313_v18 }
 0x30d   : > { %1637 = vst [vmem:[%s3533_s18 + $0x1c8] sm:$0xff] %v1573_v40  ;;  %v1478_v8 = vmul.f32 %v2126_v9, %v1409_v54  ;;  %2124 = vrsqrt.f32 %v1312_v5 }
 0x30e   : > { %v2115_v21 = vpop.eup %2114  ;;  %1610 = vst [vmem:[%s3533_s18 + $0xf0] sm:$0xff] %v1546_v17 }
 0x30f   : > { %v2117_v35 = vpop.eup %2116  ;;  %v1547_v12 = vadd.f32 %v2127_v7, %v1478_v8  ;;  %v1407_v24 = vmul.f32 %v2115_v21, %v3493_v20 }
 0x310   : > { %v1406_v10 = vmul.f32 %v2117_v35, %v3496_v6 }
 0x311   : > { %1611 = vst [vmem:[%s3533_s18 + $0xf8] sm:$0xff] %v1547_v12  ;;  %v1476_v1 = vmul.f32 %v2126_v9, %v1407_v24 }
 0x312   : > { %v2119_v59 = vpop.eup %2118  ;;  %v1475_v4 = vmul.f32 %v2126_v9, %v1406_v10 }
 0x313   : > { %v2121_v27 = vpop.eup %2120  ;;  %v1545_v56 = vadd.f32 %v2127_v7, %v1476_v1  ;;  %v1439_v25 = vmul.f32 %v2119_v59, %v3503_v0 }
 0x314   : > { %v1544_v63 = vadd.f32 %v2127_v7, %v1475_v4  ;;  %v1438_v43 = vmul.f32 %v2121_v27, %v3506_v60 }
 0x315   : > { %1609 = vst [vmem:[%s3533_s18 + $0xe8] sm:$0xff] %v1545_v56  ;;  %v1508_v38 = vmul.f32 %v2126_v9, %v1439_v25 }
 0x316   : > { %v2123_v20 = vpop.eup %2122  ;;  %1608 = vst [vmem:[%s3533_s18 + $0xe0] sm:$0xff] %v1544_v63  ;;  %v1507_v6 = vmul.f32 %v2126_v9, %v1438_v43 }
 0x317   : > { %v2125_v23 = vpop.eup %2124  ;;  %v1577_v19 = vadd.f32 %v2127_v7, %v1508_v38  ;;  %v1441_v16 = vmul.f32 %v2123_v20, %v4024_v48 }
 0x318   : > { %v1576_v61 = vadd.f32 %v2127_v7, %v1507_v6  ;;  %v1440_v26 = vmul.f32 %v2125_v23, %v4025_v14 }
 0x319   : > { %1641 = vst [vmem:[%s3533_s18 + $0x1e8] sm:$0xff] %v1577_v19  ;;  %v1510_v0 = vmul.f32 %v2126_v9, %v1441_v16 }
 0x31a   : > { %1640 = vst [vmem:[%s3533_s18 + $0x1e0] sm:$0xff] %v1576_v61  ;;  %v1509_v60 = vmul.f32 %v2126_v9, %v1440_v26 }
 0x31b   : > { %v1579_v11 = vadd.f32 %v2127_v7, %v1510_v0 }
 0x31c   : > { %v1578_v62 = vadd.f32 %v2127_v7, %v1509_v60 }
 0x31d   : > { %1643 = vst [vmem:[%s3533_s18 + $0x1f8] sm:$0xff] %v1579_v11 }
 0x31e   : > { %1642 = vst [vmem:[%s3533_s18 + $0x1f0] sm:$0xff] %v1578_v62 }
 0x31f   : > { %2227 = shalt.err (!%p2224_p2)
}
 0x320   : > { %s2228_s25 = scalar_lea.hbm %s3775_s27, 8192  ;;  %s2232_s21 = scalar_lea.hbm %s3826_s3, 16384 }
 0x321   : > { %p2229_p13 = scmp.ne.s32.totalorder %s3775_s27, %s2228_s25  ;;  %p2233_p4 = scmp.lt.u32.totalorder %s3775_s27, %s3826_s3 }
 0x322   : > { %p2234_p5 = scmp.lt.u32.totalorder %s2232_s21, %s2228_s25  ;;  %p2236_p11 = scmp.lt.u32.totalorder %s2228_s25, %s3775_s27 }
 0x323   : > { %p2230_p6 = pnand %p2229_p13, %p4026_p0 }
 0x324   : > { %p2235_p8 = por %p2234_p5, %p2233_p4 }
 0x325   : > { %p2231_p10 = pneg %p2230_p6 }
 0x326   : > { %p2237_p1 = por %p2236_p11, %p2235_p8 }
 0x328   : > { %p2238_p3 = pnand %p2237_p1, %p2231_p10 }
 0x32a   : > { %2241 = shalt.err (!%p2238_p3)
}
 0x32b   : > { %s2294_s30 = smov 128   ;;  %s2295_s18 = smov 8  }
 0x32c   : > { %1927 = dma.vmem_to_hbm [thread:$0]  (%p4026_p0), %s3777_s17, 8192, %s3775_s27, %s1645_s16, %s2294_s30, %s2294_s30, %s2295_s18  }
 0x32d PF: > { %s1673_s20 = sand.u32 1, %s2272_s12   ;;  %p4027_p7 = scmp.ne.s32.totalorder %s3893_s19, 0 }
 0x32e   : > { %p4028_p9 = scmp.ge.s32.totalorder %s2284_s15, 2  ;;  %s1674_s24 = scalar_lea.sflag [#allocation4], %s1673_s20 }
 0x330   : > { %p1941_p12 = pnand %p4028_p9, %p4027_p7 }
 0x332   : > { %2267 = dma.done.wait (!%p1941_p12), %s1674_s24, 8192  }
 0x333   : > { %2269 = vsyncadd (!%p1941_p12), %s1674_s24, 4294959104  ;;  %p17_p2 = scmp.ge.s32.totalorder %s2426_s4, 4   ;;  %s4029_s12 = smov %s2276_s13 }
 0x334   : > { %s4030_s13 = smov %s2280_s14  ;;  %s4031_s14 = smov %s2442_s7 }
 0x335   : > { %s4032_s15 = smov %s2426_s4  ;;  %19 = sbr.rel (!%p17_p2) target bundleno = 6 (0x6), region = 85 }
 0x33c   :  { %1679 = vsyncpa [#allocation3], 1 }
 0x33d   :  { %1681 = vsyncpa [#allocation3 + $0x1], 1 }
 0x33e   :  { %1682 = vsyncpa [#allocation6], 1 }
 0x33f   :  { %1683 = vsyncpa [#allocation4], 1 }
 0x340   :  { %1685 = vsyncpa [#allocation4 + $0x1], 1 }

</bundles_post_ra>
